<compile_context>
chip_gen: v5e
topology: v5e:2x2
jax: 0.10.0
libtpu: 0.0.40
codegen_flags: <defaults>
</compile_context>

<pallas_src>
import functools

import jax
import jax.numpy as jnp
from jax.experimental import pallas as pl
from jax.experimental.pallas import tpu as pltpu

DROPOUT_P = 0.8
N_HEADS = 4


def _fused_attn_kernel(x_ref, u_ref, wq_ref, bq_ref, wk_ref, bk_ref,
                       wv_ref, bv_ref, o_ref):
    """One grid step per batch: conv1x1(+pad) -> QK^T -> softmax -> dropout -> @V.

    x_ref : (1, 3, Sh, Sw)  zero-padded input planes                (VMEM)
    u_ref : (1, H, Sh, Sh)  uniform [0,1) dropout randoms           (VMEM)
    w*_ref, b*_ref          conv weights / biases (query pre-scaled) (SMEM)
    o_ref : (1, H, Sh, Sw)  output                                   (VMEM)
    """
    p0 = x_ref[0, 0]
    p1 = x_ref[0, 1]
    p2 = x_ref[0, 2]

    def conv_plane(w_ref, b_ref, h):
        # 1x1 conv on the zero-padded input == scalar-weighted channel mix.
        return (w_ref[h, 0] * p0 + w_ref[h, 1] * p1 + w_ref[h, 2] * p2
                + b_ref[h])

    k = conv_plane(wk_ref, bk_ref, 0)        # (Sh, Sw), shared by all heads
    kt = k.T                                 # hoisted out of the head loop

    inv_keep = 1.0 / (1.0 - DROPOUT_P)

    for h in range(N_HEADS):                 # static unroll, one grid step
        q_h = conv_plane(wq_ref, bq_ref, h)  # softmax scale already folded in
        v_h = conv_plane(wv_ref, bv_ref, h)

        logits = jnp.dot(q_h, kt, preferred_element_type=jnp.float32)

        m = jnp.max(logits, axis=-1, keepdims=True)
        e = jnp.exp(logits - m)
        probs = e / jnp.sum(e, axis=-1, keepdims=True)

        # inverted dropout, p = 0.8: keep with prob 0.2, scale survivors by 5
        keep = u_ref[0, h] >= DROPOUT_P
        probs = jnp.where(keep, probs * inv_keep, 0.0)

        o_ref[0, h] = jnp.dot(probs, v_h, preferred_element_type=jnp.float32)


def fused_attention(x_pad, u, wq, bq, wk, bk, wv, bv):
    """x_pad: (B, 3, Sh, Sw), u: (B, H, Sh, Sh) -> (B, H, Sh, Sw)."""
    B, C, Sh, Sw = x_pad.shape
    H = wq.shape[0]
    smem_spec = pl.BlockSpec(memory_space=pltpu.MemorySpace.SMEM)
    return pl.pallas_call(
        _fused_attn_kernel,
        out_shape=jax.ShapeDtypeStruct((B, H, Sh, Sw), jnp.float32),
        grid=(B,),
        in_specs=[
            pl.BlockSpec((1, C, Sh, Sw), lambda b: (b, 0, 0, 0)),
            pl.BlockSpec((1, H, Sh, Sh), lambda b: (b, 0, 0, 0)),
            smem_spec, smem_spec, smem_spec, smem_spec, smem_spec, smem_spec,
        ],
        out_specs=pl.BlockSpec((1, H, Sh, Sw), lambda b: (b, 0, 0, 0)),
        compiler_params=pltpu.CompilerParams(
            dimension_semantics=("parallel",)),
    )(x_pad, u, wq, bq, wk, bk, wv, bv)


class Model:
    def __init__(self, key):
        k1, k2, k3, k4, k5, k6 = jax.random.split(key, 6)
        # query: Conv2d(3, 4, 1, stride=1, padding=1)
        self.wq = jax.random.normal(k1, (4, 3), jnp.float32) * 0.2
        self.bq = jax.random.normal(k2, (4,), jnp.float32) * 0.1
        # key: Conv2d(3, 1, 1, stride=1, padding=1)
        self.wk = jax.random.normal(k3, (1, 3), jnp.float32) * 0.2
        self.bk = jax.random.normal(k4, (1,), jnp.float32) * 0.1
        # value: Conv2d(3, 4, 1, stride=1, padding=1)  (missing in original)
        self.wv = jax.random.normal(k5, (4, 3), jnp.float32) * 0.2
        self.bv = jax.random.normal(k6, (4,), jnp.float32) * 0.1

    @functools.partial(jax.jit, static_argnums=0)
    def forward(self, x, dropout_key):
        B, C, Hin, Win = x.shape
        Sh, Sw = Hin + 2, Win + 2
        # PyTorch Conv2d(kernel=1, padding=1): zero-pad the input once; the
        # conv itself is done inside the Pallas kernel.
        xp = jnp.pad(x, ((0, 0), (0, 0), (1, 1), (1, 1)))
        # Dropout randoms for the (Sh, Sh) attention matrix of each head.
        u = jax.random.uniform(dropout_key, (B, N_HEADS, Sh, Sh), jnp.float32)
        # Fold scale_factor = q.size(-1) ** -0.5 into the query conv params.
        scale = float(Sw) ** -0.5
        return fused_attention(xp, u, self.wq * scale, self.bq * scale,
                               self.wk, self.bk, self.wv, self.bv)


def _reference_forward(model, x, dropout_key):
    """Pure-jnp reference using the same dropout randoms (self-check)."""
    B, C, Hin, Win = x.shape
    scale = float(Win + 2) ** -0.5
    xp = jnp.pad(x, ((0, 0), (0, 0), (1, 1), (1, 1)))
    q = jnp.einsum("oc,bchw->bohw", model.wq, xp) + model.bq[None, :, None, None]
    k = jnp.einsum("oc,bchw->bohw", model.wk, xp)[:, 0] + model.bk[0]
    v = jnp.einsum("oc,bchw->bohw", model.wv, xp) + model.bv[None, :, None, None]
    logits = jnp.einsum("bhiw,bjw->bhij", q, k) * scale
    p = jax.nn.softmax(logits, axis=-1)
    u = jax.random.uniform(dropout_key, p.shape, jnp.float32)
    p = jnp.where(u >= DROPOUT_P, p / (1.0 - DROPOUT_P), 0.0)
    return jnp.einsum("bhij,bhjw->bhiw", p, v)


if __name__ == "__main__":
    root = jax.random.PRNGKey(0)
    pkey, xkey, dkey = jax.random.split(root, 3)

    model = Model(pkey)

    # small shape consistent with the module (original was (1, 3, 64, 64))
    x1 = jax.random.normal(xkey, (1, 3, 16, 16), jnp.float32)

    out = model.forward(x1, dkey)
    out = jax.block_until_ready(out)

    assert out.shape == (1, 4, 18, 18), out.shape
    assert bool(jnp.all(jnp.isfinite(out)))

    ref = _reference_forward(model, x1, dkey)
    assert bool(jnp.allclose(out, ref, atol=5e-2, rtol=5e-2)), \
        float(jnp.max(jnp.abs(out - ref)))

    print("KERNEL_OK")
</pallas_src>

<mosaic_0001>
module attributes {stable_mosaic.version = 11 : i64} {
  func.func @_fused_attn_kernel(%arg0: i32, %arg1: memref<1x3x18x18xf32, #tpu.memory_space<vmem>>, %arg2: memref<1x4x18x18xf32, #tpu.memory_space<vmem>>, %arg3: memref<4x3xf32, #tpu.memory_space<smem>>, %arg4: memref<4xf32, #tpu.memory_space<smem>>, %arg5: memref<1x3xf32, #tpu.memory_space<smem>>, %arg6: memref<1xf32, #tpu.memory_space<smem>>, %arg7: memref<4x3xf32, #tpu.memory_space<smem>>, %arg8: memref<4xf32, #tpu.memory_space<smem>>, %arg9: memref<1x4x18x18xf32, #tpu.memory_space<vmem>>) attributes {dimension_semantics = [#tpu.dimension_semantics<parallel>], iteration_bounds = array<i64: 1>, scalar_prefetch = 0 : i64, scratch_operands = 0 : i64, tpu.core_type = #tpu.core_type<tc>, window_params = [{transform_indices = @transform_0, window_bounds = array<i64: 1, 3, 18, 18>}, {transform_indices = @transform_1, window_bounds = array<i64: 1, 4, 18, 18>}, {transform_indices = @transform_2, window_bounds = array<i64: 4, 3>}, {transform_indices = @transform_3, window_bounds = array<i64: 4>}, {transform_indices = @transform_4, window_bounds = array<i64: 1, 3>}, {transform_indices = @transform_5, window_bounds = array<i64: 1>}, {transform_indices = @transform_6, window_bounds = array<i64: 4, 3>}, {transform_indices = @transform_7, window_bounds = array<i64: 4>}, {transform_indices = @transform_8, window_bounds = array<i64: 1, 4, 18, 18>}]} {
    %c0 = arith.constant 0 : index
    %c0_0 = arith.constant 0 : index
    %c0_1 = arith.constant 0 : index
    %c0_2 = arith.constant 0 : index
    %0 = vector.load %arg1[%c0, %c0_0, %c0_1, %c0_2] : memref<1x3x18x18xf32, #tpu.memory_space<vmem>>, vector<1x1x18x18xf32>
    %1 = vector.shape_cast %0 : vector<1x1x18x18xf32> to vector<18x18xf32>
    %c0_3 = arith.constant 0 : index
    %c1 = arith.constant 1 : index
    %c0_4 = arith.constant 0 : index
    %c0_5 = arith.constant 0 : index
    %2 = vector.load %arg1[%c0_3, %c1, %c0_4, %c0_5] : memref<1x3x18x18xf32, #tpu.memory_space<vmem>>, vector<1x1x18x18xf32>
    %3 = vector.shape_cast %2 : vector<1x1x18x18xf32> to vector<18x18xf32>
    %c0_6 = arith.constant 0 : index
    %c2 = arith.constant 2 : index
    %c0_7 = arith.constant 0 : index
    %c0_8 = arith.constant 0 : index
    %4 = vector.load %arg1[%c0_6, %c2, %c0_7, %c0_8] : memref<1x3x18x18xf32, #tpu.memory_space<vmem>>, vector<1x1x18x18xf32>
    %5 = vector.shape_cast %4 : vector<1x1x18x18xf32> to vector<18x18xf32>
    %c0_9 = arith.constant 0 : index
    %c0_10 = arith.constant 0 : index
    %6 = memref.load %arg5[%c0_9, %c0_10] : memref<1x3xf32, #tpu.memory_space<smem>>
    %7 = vector.broadcast %6 : f32 to vector<18x18xf32>
    %8 = arith.mulf %7, %1 : vector<18x18xf32>
    %c0_11 = arith.constant 0 : index
    %c1_12 = arith.constant 1 : index
    %9 = memref.load %arg5[%c0_11, %c1_12] : memref<1x3xf32, #tpu.memory_space<smem>>
    %10 = vector.broadcast %9 : f32 to vector<18x18xf32>
    %11 = arith.mulf %10, %3 : vector<18x18xf32>
    %12 = arith.addf %8, %11 : vector<18x18xf32>
    %c0_13 = arith.constant 0 : index
    %c2_14 = arith.constant 2 : index
    %13 = memref.load %arg5[%c0_13, %c2_14] : memref<1x3xf32, #tpu.memory_space<smem>>
    %14 = vector.broadcast %13 : f32 to vector<18x18xf32>
    %15 = arith.mulf %14, %5 : vector<18x18xf32>
    %16 = arith.addf %12, %15 : vector<18x18xf32>
    %c0_15 = arith.constant 0 : index
    %17 = memref.load %arg6[%c0_15] : memref<1xf32, #tpu.memory_space<smem>>
    %18 = vector.broadcast %17 : f32 to vector<18x18xf32>
    %19 = arith.addf %16, %18 : vector<18x18xf32>
    %20 = tpu.transpose %19, [1, 0] : vector<18x18xf32> -> vector<18x18xf32>
    %c0_16 = arith.constant 0 : index
    %c0_17 = arith.constant 0 : index
    %21 = memref.load %arg3[%c0_16, %c0_17] : memref<4x3xf32, #tpu.memory_space<smem>>
    %22 = vector.broadcast %21 : f32 to vector<18x18xf32>
    %23 = arith.mulf %22, %1 : vector<18x18xf32>
    %c0_18 = arith.constant 0 : index
    %c1_19 = arith.constant 1 : index
    %24 = memref.load %arg3[%c0_18, %c1_19] : memref<4x3xf32, #tpu.memory_space<smem>>
    %25 = vector.broadcast %24 : f32 to vector<18x18xf32>
    %26 = arith.mulf %25, %3 : vector<18x18xf32>
    %27 = arith.addf %23, %26 : vector<18x18xf32>
    %c0_20 = arith.constant 0 : index
    %c2_21 = arith.constant 2 : index
    %28 = memref.load %arg3[%c0_20, %c2_21] : memref<4x3xf32, #tpu.memory_space<smem>>
    %29 = vector.broadcast %28 : f32 to vector<18x18xf32>
    %30 = arith.mulf %29, %5 : vector<18x18xf32>
    %31 = arith.addf %27, %30 : vector<18x18xf32>
    %c0_22 = arith.constant 0 : index
    %32 = memref.load %arg4[%c0_22] : memref<4xf32, #tpu.memory_space<smem>>
    %33 = vector.broadcast %32 : f32 to vector<18x18xf32>
    %34 = arith.addf %31, %33 : vector<18x18xf32>
    %c0_23 = arith.constant 0 : index
    %c0_24 = arith.constant 0 : index
    %35 = memref.load %arg7[%c0_23, %c0_24] : memref<4x3xf32, #tpu.memory_space<smem>>
    %36 = vector.broadcast %35 : f32 to vector<18x18xf32>
    %37 = arith.mulf %36, %1 : vector<18x18xf32>
    %c0_25 = arith.constant 0 : index
    %c1_26 = arith.constant 1 : index
    %38 = memref.load %arg7[%c0_25, %c1_26] : memref<4x3xf32, #tpu.memory_space<smem>>
    %39 = vector.broadcast %38 : f32 to vector<18x18xf32>
    %40 = arith.mulf %39, %3 : vector<18x18xf32>
    %41 = arith.addf %37, %40 : vector<18x18xf32>
    %c0_27 = arith.constant 0 : index
    %c2_28 = arith.constant 2 : index
    %42 = memref.load %arg7[%c0_27, %c2_28] : memref<4x3xf32, #tpu.memory_space<smem>>
    %43 = vector.broadcast %42 : f32 to vector<18x18xf32>
    %44 = arith.mulf %43, %5 : vector<18x18xf32>
    %45 = arith.addf %41, %44 : vector<18x18xf32>
    %c0_29 = arith.constant 0 : index
    %46 = memref.load %arg8[%c0_29] : memref<4xf32, #tpu.memory_space<smem>>
    %47 = vector.broadcast %46 : f32 to vector<18x18xf32>
    %48 = arith.addf %45, %47 : vector<18x18xf32>
    %cst = arith.constant dense<0.000000e+00> : vector<18x18xf32>
    %49 = tpu.matmul %34, %20, %cst {dimension_numbers = #tpu.dot_dimension_numbers<[1], [0], [0], [1], [0, 0, 1, 1], [], []>} : vector<18x18xf32>, vector<18x18xf32>, vector<18x18xf32> -> vector<18x18xf32>
    %cst_30 = arith.constant dense<0xFF800000> : vector<18xf32>
    %50 = vector.multi_reduction <maximumf>, %49, %cst_30 [1] : vector<18x18xf32> to vector<18xf32>
    %51 = vector.shape_cast %50 : vector<18xf32> to vector<18x1xf32>
    %52 = vector.broadcast %51 : vector<18x1xf32> to vector<18x18xf32>
    %53 = arith.subf %49, %52 : vector<18x18xf32>
    %54 = math.exp %53 : vector<18x18xf32>
    %cst_31 = arith.constant dense<0.000000e+00> : vector<18xf32>
    %55 = vector.multi_reduction <add>, %54, %cst_31 [1] : vector<18x18xf32> to vector<18xf32>
    %56 = vector.shape_cast %55 : vector<18xf32> to vector<18x1xf32>
    %57 = vector.broadcast %56 : vector<18x1xf32> to vector<18x18xf32>
    %58 = arith.divf %54, %57 : vector<18x18xf32>
    %c0_32 = arith.constant 0 : index
    %c0_33 = arith.constant 0 : index
    %c0_34 = arith.constant 0 : index
    %c0_35 = arith.constant 0 : index
    %59 = vector.load %arg2[%c0_32, %c0_33, %c0_34, %c0_35] : memref<1x4x18x18xf32, #tpu.memory_space<vmem>>, vector<1x1x18x18xf32>
    %60 = vector.shape_cast %59 : vector<1x1x18x18xf32> to vector<18x18xf32>
    %cst_36 = arith.constant 8.000000e-01 : f32
    %61 = vector.broadcast %cst_36 : f32 to vector<18x18xf32>
    %62 = arith.cmpf oge, %60, %61 : vector<18x18xf32>
    %cst_37 = arith.constant 5.000000e+00 : f32
    %63 = vector.broadcast %cst_37 : f32 to vector<18x18xf32>
    %64 = arith.mulf %58, %63 : vector<18x18xf32>
    %cst_38 = arith.constant 0.000000e+00 : f32
    %65 = vector.broadcast %cst_38 : f32 to vector<18x18xf32>
    %66 = arith.select %62, %64, %65 : vector<18x18xi1>, vector<18x18xf32>
    %cst_39 = arith.constant dense<0.000000e+00> : vector<18x18xf32>
    %67 = tpu.matmul %66, %48, %cst_39 {dimension_numbers = #tpu.dot_dimension_numbers<[1], [0], [0], [1], [0, 0, 1, 1], [], []>} : vector<18x18xf32>, vector<18x18xf32>, vector<18x18xf32> -> vector<18x18xf32>
    %c0_40 = arith.constant 0 : index
    %c0_41 = arith.constant 0 : index
    %c0_42 = arith.constant 0 : index
    %c0_43 = arith.constant 0 : index
    %68 = vector.load %arg9[%c0_40, %c0_41, %c0_42, %c0_43] : memref<1x4x18x18xf32, #tpu.memory_space<vmem>>, vector<1x1x18x18xf32>
    %69 = vector.shape_cast %68 : vector<1x1x18x18xf32> to vector<18x18xf32>
    %70 = vector.shape_cast %67 : vector<18x18xf32> to vector<1x1x18x18xf32>
    tpu.vector_store %arg9[%c0_40, %c0_41, %c0_42, %c0_43], %70 {strides = array<i32>} : memref<1x4x18x18xf32, #tpu.memory_space<vmem>>, vector<1x1x18x18xf32>,
    %c1_44 = arith.constant 1 : index
    %c0_45 = arith.constant 0 : index
    %71 = memref.load %arg3[%c1_44, %c0_45] : memref<4x3xf32, #tpu.memory_space<smem>>
    %72 = vector.broadcast %71 : f32 to vector<18x18xf32>
    %73 = arith.mulf %72, %1 : vector<18x18xf32>
    %c1_46 = arith.constant 1 : index
    %c1_47 = arith.constant 1 : index
    %74 = memref.load %arg3[%c1_46, %c1_47] : memref<4x3xf32, #tpu.memory_space<smem>>
    %75 = vector.broadcast %74 : f32 to vector<18x18xf32>
    %76 = arith.mulf %75, %3 : vector<18x18xf32>
    %77 = arith.addf %73, %76 : vector<18x18xf32>
    %c1_48 = arith.constant 1 : index
    %c2_49 = arith.constant 2 : index
    %78 = memref.load %arg3[%c1_48, %c2_49] : memref<4x3xf32, #tpu.memory_space<smem>>
    %79 = vector.broadcast %78 : f32 to vector<18x18xf32>
    %80 = arith.mulf %79, %5 : vector<18x18xf32>
    %81 = arith.addf %77, %80 : vector<18x18xf32>
    %c1_50 = arith.constant 1 : index
    %82 = memref.load %arg4[%c1_50] : memref<4xf32, #tpu.memory_space<smem>>
    %83 = vector.broadcast %82 : f32 to vector<18x18xf32>
    %84 = arith.addf %81, %83 : vector<18x18xf32>
    %c1_51 = arith.constant 1 : index
    %c0_52 = arith.constant 0 : index
    %85 = memref.load %arg7[%c1_51, %c0_52] : memref<4x3xf32, #tpu.memory_space<smem>>
    %86 = vector.broadcast %85 : f32 to vector<18x18xf32>
    %87 = arith.mulf %86, %1 : vector<18x18xf32>
    %c1_53 = arith.constant 1 : index
    %c1_54 = arith.constant 1 : index
    %88 = memref.load %arg7[%c1_53, %c1_54] : memref<4x3xf32, #tpu.memory_space<smem>>
    %89 = vector.broadcast %88 : f32 to vector<18x18xf32>
    %90 = arith.mulf %89, %3 : vector<18x18xf32>
    %91 = arith.addf %87, %90 : vector<18x18xf32>
    %c1_55 = arith.constant 1 : index
    %c2_56 = arith.constant 2 : index
    %92 = memref.load %arg7[%c1_55, %c2_56] : memref<4x3xf32, #tpu.memory_space<smem>>
    %93 = vector.broadcast %92 : f32 to vector<18x18xf32>
    %94 = arith.mulf %93, %5 : vector<18x18xf32>
    %95 = arith.addf %91, %94 : vector<18x18xf32>
    %c1_57 = arith.constant 1 : index
    %96 = memref.load %arg8[%c1_57] : memref<4xf32, #tpu.memory_space<smem>>
    %97 = vector.broadcast %96 : f32 to vector<18x18xf32>
    %98 = arith.addf %95, %97 : vector<18x18xf32>
    %cst_58 = arith.constant dense<0.000000e+00> : vector<18x18xf32>
    %99 = tpu.matmul %84, %20, %cst_58 {dimension_numbers = #tpu.dot_dimension_numbers<[1], [0], [0], [1], [0, 0, 1, 1], [], []>} : vector<18x18xf32>, vector<18x18xf32>, vector<18x18xf32> -> vector<18x18xf32>
    %cst_59 = arith.constant dense<0xFF800000> : vector<18xf32>
    %100 = vector.multi_reduction <maximumf>, %99, %cst_59 [1] : vector<18x18xf32> to vector<18xf32>
    %101 = vector.shape_cast %100 : vector<18xf32> to vector<18x1xf32>
    %102 = vector.broadcast %101 : vector<18x1xf32> to vector<18x18xf32>
    %103 = arith.subf %99, %102 : vector<18x18xf32>
    %104 = math.exp %103 : vector<18x18xf32>
    %cst_60 = arith.constant dense<0.000000e+00> : vector<18xf32>
    %105 = vector.multi_reduction <add>, %104, %cst_60 [1] : vector<18x18xf32> to vector<18xf32>
    %106 = vector.shape_cast %105 : vector<18xf32> to vector<18x1xf32>
    %107 = vector.broadcast %106 : vector<18x1xf32> to vector<18x18xf32>
    %108 = arith.divf %104, %107 : vector<18x18xf32>
    %c0_61 = arith.constant 0 : index
    %c1_62 = arith.constant 1 : index
    %c0_63 = arith.constant 0 : index
    %c0_64 = arith.constant 0 : index
    %109 = vector.load %arg2[%c0_61, %c1_62, %c0_63, %c0_64] : memref<1x4x18x18xf32, #tpu.memory_space<vmem>>, vector<1x1x18x18xf32>
    %110 = vector.shape_cast %109 : vector<1x1x18x18xf32> to vector<18x18xf32>
    %cst_65 = arith.constant 8.000000e-01 : f32
    %111 = vector.broadcast %cst_65 : f32 to vector<18x18xf32>
    %112 = arith.cmpf oge, %110, %111 : vector<18x18xf32>
    %cst_66 = arith.constant 5.000000e+00 : f32
    %113 = vector.broadcast %cst_66 : f32 to vector<18x18xf32>
    %114 = arith.mulf %108, %113 : vector<18x18xf32>
    %cst_67 = arith.constant 0.000000e+00 : f32
    %115 = vector.broadcast %cst_67 : f32 to vector<18x18xf32>
    %116 = arith.select %112, %114, %115 : vector<18x18xi1>, vector<18x18xf32>
    %cst_68 = arith.constant dense<0.000000e+00> : vector<18x18xf32>
    %117 = tpu.matmul %116, %98, %cst_68 {dimension_numbers = #tpu.dot_dimension_numbers<[1], [0], [0], [1], [0, 0, 1, 1], [], []>} : vector<18x18xf32>, vector<18x18xf32>, vector<18x18xf32> -> vector<18x18xf32>
    %c0_69 = arith.constant 0 : index
    %c1_70 = arith.constant 1 : index
    %c0_71 = arith.constant 0 : index
    %c0_72 = arith.constant 0 : index
    %118 = vector.load %arg9[%c0_69, %c1_70, %c0_71, %c0_72] : memref<1x4x18x18xf32, #tpu.memory_space<vmem>>, vector<1x1x18x18xf32>
    %119 = vector.shape_cast %118 : vector<1x1x18x18xf32> to vector<18x18xf32>
    %120 = vector.shape_cast %117 : vector<18x18xf32> to vector<1x1x18x18xf32>
    tpu.vector_store %arg9[%c0_69, %c1_70, %c0_71, %c0_72], %120 {strides = array<i32>} : memref<1x4x18x18xf32, #tpu.memory_space<vmem>>, vector<1x1x18x18xf32>,
    %c2_73 = arith.constant 2 : index
    %c0_74 = arith.constant 0 : index
    %121 = memref.load %arg3[%c2_73, %c0_74] : memref<4x3xf32, #tpu.memory_space<smem>>
    %122 = vector.broadcast %121 : f32 to vector<18x18xf32>
    %123 = arith.mulf %122, %1 : vector<18x18xf32>
    %c2_75 = arith.constant 2 : index
    %c1_76 = arith.constant 1 : index
    %124 = memref.load %arg3[%c2_75, %c1_76] : memref<4x3xf32, #tpu.memory_space<smem>>
    %125 = vector.broadcast %124 : f32 to vector<18x18xf32>
    %126 = arith.mulf %125, %3 : vector<18x18xf32>
    %127 = arith.addf %123, %126 : vector<18x18xf32>
    %c2_77 = arith.constant 2 : index
    %c2_78 = arith.constant 2 : index
    %128 = memref.load %arg3[%c2_77, %c2_78] : memref<4x3xf32, #tpu.memory_space<smem>>
    %129 = vector.broadcast %128 : f32 to vector<18x18xf32>
    %130 = arith.mulf %129, %5 : vector<18x18xf32>
    %131 = arith.addf %127, %130 : vector<18x18xf32>
    %c2_79 = arith.constant 2 : index
    %132 = memref.load %arg4[%c2_79] : memref<4xf32, #tpu.memory_space<smem>>
    %133 = vector.broadcast %132 : f32 to vector<18x18xf32>
    %134 = arith.addf %131, %133 : vector<18x18xf32>
    %c2_80 = arith.constant 2 : index
    %c0_81 = arith.constant 0 : index
    %135 = memref.load %arg7[%c2_80, %c0_81] : memref<4x3xf32, #tpu.memory_space<smem>>
    %136 = vector.broadcast %135 : f32 to vector<18x18xf32>
    %137 = arith.mulf %136, %1 : vector<18x18xf32>
    %c2_82 = arith.constant 2 : index
    %c1_83 = arith.constant 1 : index
    %138 = memref.load %arg7[%c2_82, %c1_83] : memref<4x3xf32, #tpu.memory_space<smem>>
    %139 = vector.broadcast %138 : f32 to vector<18x18xf32>
    %140 = arith.mulf %139, %3 : vector<18x18xf32>
    %141 = arith.addf %137, %140 : vector<18x18xf32>
    %c2_84 = arith.constant 2 : index
    %c2_85 = arith.constant 2 : index
    %142 = memref.load %arg7[%c2_84, %c2_85] : memref<4x3xf32, #tpu.memory_space<smem>>
    %143 = vector.broadcast %142 : f32 to vector<18x18xf32>
    %144 = arith.mulf %143, %5 : vector<18x18xf32>
    %145 = arith.addf %141, %144 : vector<18x18xf32>
    %c2_86 = arith.constant 2 : index
    %146 = memref.load %arg8[%c2_86] : memref<4xf32, #tpu.memory_space<smem>>
    %147 = vector.broadcast %146 : f32 to vector<18x18xf32>
    %148 = arith.addf %145, %147 : vector<18x18xf32>
    %cst_87 = arith.constant dense<0.000000e+00> : vector<18x18xf32>
    %149 = tpu.matmul %134, %20, %cst_87 {dimension_numbers = #tpu.dot_dimension_numbers<[1], [0], [0], [1], [0, 0, 1, 1], [], []>} : vector<18x18xf32>, vector<18x18xf32>, vector<18x18xf32> -> vector<18x18xf32>
    %cst_88 = arith.constant dense<0xFF800000> : vector<18xf32>
    %150 = vector.multi_reduction <maximumf>, %149, %cst_88 [1] : vector<18x18xf32> to vector<18xf32>
    %151 = vector.shape_cast %150 : vector<18xf32> to vector<18x1xf32>
    %152 = vector.broadcast %151 : vector<18x1xf32> to vector<18x18xf32>
    %153 = arith.subf %149, %152 : vector<18x18xf32>
    %154 = math.exp %153 : vector<18x18xf32>
    %cst_89 = arith.constant dense<0.000000e+00> : vector<18xf32>
    %155 = vector.multi_reduction <add>, %154, %cst_89 [1] : vector<18x18xf32> to vector<18xf32>
    %156 = vector.shape_cast %155 : vector<18xf32> to vector<18x1xf32>
    %157 = vector.broadcast %156 : vector<18x1xf32> to vector<18x18xf32>
    %158 = arith.divf %154, %157 : vector<18x18xf32>
    %c0_90 = arith.constant 0 : index
    %c2_91 = arith.constant 2 : index
    %c0_92 = arith.constant 0 : index
    %c0_93 = arith.constant 0 : index
    %159 = vector.load %arg2[%c0_90, %c2_91, %c0_92, %c0_93] : memref<1x4x18x18xf32, #tpu.memory_space<vmem>>, vector<1x1x18x18xf32>
    %160 = vector.shape_cast %159 : vector<1x1x18x18xf32> to vector<18x18xf32>
    %cst_94 = arith.constant 8.000000e-01 : f32
    %161 = vector.broadcast %cst_94 : f32 to vector<18x18xf32>
    %162 = arith.cmpf oge, %160, %161 : vector<18x18xf32>
    %cst_95 = arith.constant 5.000000e+00 : f32
    %163 = vector.broadcast %cst_95 : f32 to vector<18x18xf32>
    %164 = arith.mulf %158, %163 : vector<18x18xf32>
    %cst_96 = arith.constant 0.000000e+00 : f32
    %165 = vector.broadcast %cst_96 : f32 to vector<18x18xf32>
    %166 = arith.select %162, %164, %165 : vector<18x18xi1>, vector<18x18xf32>
    %cst_97 = arith.constant dense<0.000000e+00> : vector<18x18xf32>
    %167 = tpu.matmul %166, %148, %cst_97 {dimension_numbers = #tpu.dot_dimension_numbers<[1], [0], [0], [1], [0, 0, 1, 1], [], []>} : vector<18x18xf32>, vector<18x18xf32>, vector<18x18xf32> -> vector<18x18xf32>
    %c0_98 = arith.constant 0 : index
    %c2_99 = arith.constant 2 : index
    %c0_100 = arith.constant 0 : index
    %c0_101 = arith.constant 0 : index
    %168 = vector.load %arg9[%c0_98, %c2_99, %c0_100, %c0_101] : memref<1x4x18x18xf32, #tpu.memory_space<vmem>>, vector<1x1x18x18xf32>
    %169 = vector.shape_cast %168 : vector<1x1x18x18xf32> to vector<18x18xf32>
    %170 = vector.shape_cast %167 : vector<18x18xf32> to vector<1x1x18x18xf32>
    tpu.vector_store %arg9[%c0_98, %c2_99, %c0_100, %c0_101], %170 {strides = array<i32>} : memref<1x4x18x18xf32, #tpu.memory_space<vmem>>, vector<1x1x18x18xf32>,
    %c3 = arith.constant 3 : index
    %c0_102 = arith.constant 0 : index
    %171 = memref.load %arg3[%c3, %c0_102] : memref<4x3xf32, #tpu.memory_space<smem>>
    %172 = vector.broadcast %171 : f32 to vector<18x18xf32>
    %173 = arith.mulf %172, %1 : vector<18x18xf32>
    %c3_103 = arith.constant 3 : index
    %c1_104 = arith.constant 1 : index
    %174 = memref.load %arg3[%c3_103, %c1_104] : memref<4x3xf32, #tpu.memory_space<smem>>
    %175 = vector.broadcast %174 : f32 to vector<18x18xf32>
    %176 = arith.mulf %175, %3 : vector<18x18xf32>
    %177 = arith.addf %173, %176 : vector<18x18xf32>
    %c3_105 = arith.constant 3 : index
    %c2_106 = arith.constant 2 : index
    %178 = memref.load %arg3[%c3_105, %c2_106] : memref<4x3xf32, #tpu.memory_space<smem>>
    %179 = vector.broadcast %178 : f32 to vector<18x18xf32>
    %180 = arith.mulf %179, %5 : vector<18x18xf32>
    %181 = arith.addf %177, %180 : vector<18x18xf32>
    %c3_107 = arith.constant 3 : index
    %182 = memref.load %arg4[%c3_107] : memref<4xf32, #tpu.memory_space<smem>>
    %183 = vector.broadcast %182 : f32 to vector<18x18xf32>
    %184 = arith.addf %181, %183 : vector<18x18xf32>
    %c3_108 = arith.constant 3 : index
    %c0_109 = arith.constant 0 : index
    %185 = memref.load %arg7[%c3_108, %c0_109] : memref<4x3xf32, #tpu.memory_space<smem>>
    %186 = vector.broadcast %185 : f32 to vector<18x18xf32>
    %187 = arith.mulf %186, %1 : vector<18x18xf32>
    %c3_110 = arith.constant 3 : index
    %c1_111 = arith.constant 1 : index
    %188 = memref.load %arg7[%c3_110, %c1_111] : memref<4x3xf32, #tpu.memory_space<smem>>
    %189 = vector.broadcast %188 : f32 to vector<18x18xf32>
    %190 = arith.mulf %189, %3 : vector<18x18xf32>
    %191 = arith.addf %187, %190 : vector<18x18xf32>
    %c3_112 = arith.constant 3 : index
    %c2_113 = arith.constant 2 : index
    %192 = memref.load %arg7[%c3_112, %c2_113] : memref<4x3xf32, #tpu.memory_space<smem>>
    %193 = vector.broadcast %192 : f32 to vector<18x18xf32>
    %194 = arith.mulf %193, %5 : vector<18x18xf32>
    %195 = arith.addf %191, %194 : vector<18x18xf32>
    %c3_114 = arith.constant 3 : index
    %196 = memref.load %arg8[%c3_114] : memref<4xf32, #tpu.memory_space<smem>>
    %197 = vector.broadcast %196 : f32 to vector<18x18xf32>
    %198 = arith.addf %195, %197 : vector<18x18xf32>
    %cst_115 = arith.constant dense<0.000000e+00> : vector<18x18xf32>
    %199 = tpu.matmul %184, %20, %cst_115 {dimension_numbers = #tpu.dot_dimension_numbers<[1], [0], [0], [1], [0, 0, 1, 1], [], []>} : vector<18x18xf32>, vector<18x18xf32>, vector<18x18xf32> -> vector<18x18xf32>
    %cst_116 = arith.constant dense<0xFF800000> : vector<18xf32>
    %200 = vector.multi_reduction <maximumf>, %199, %cst_116 [1] : vector<18x18xf32> to vector<18xf32>
    %201 = vector.shape_cast %200 : vector<18xf32> to vector<18x1xf32>
    %202 = vector.broadcast %201 : vector<18x1xf32> to vector<18x18xf32>
    %203 = arith.subf %199, %202 : vector<18x18xf32>
    %204 = math.exp %203 : vector<18x18xf32>
    %cst_117 = arith.constant dense<0.000000e+00> : vector<18xf32>
    %205 = vector.multi_reduction <add>, %204, %cst_117 [1] : vector<18x18xf32> to vector<18xf32>
    %206 = vector.shape_cast %205 : vector<18xf32> to vector<18x1xf32>
    %207 = vector.broadcast %206 : vector<18x1xf32> to vector<18x18xf32>
    %208 = arith.divf %204, %207 : vector<18x18xf32>
    %c0_118 = arith.constant 0 : index
    %c3_119 = arith.constant 3 : index
    %c0_120 = arith.constant 0 : index
    %c0_121 = arith.constant 0 : index
    %209 = vector.load %arg2[%c0_118, %c3_119, %c0_120, %c0_121] : memref<1x4x18x18xf32, #tpu.memory_space<vmem>>, vector<1x1x18x18xf32>
    %210 = vector.shape_cast %209 : vector<1x1x18x18xf32> to vector<18x18xf32>
    %cst_122 = arith.constant 8.000000e-01 : f32
    %211 = vector.broadcast %cst_122 : f32 to vector<18x18xf32>
    %212 = arith.cmpf oge, %210, %211 : vector<18x18xf32>
    %cst_123 = arith.constant 5.000000e+00 : f32
    %213 = vector.broadcast %cst_123 : f32 to vector<18x18xf32>
    %214 = arith.mulf %208, %213 : vector<18x18xf32>
    %cst_124 = arith.constant 0.000000e+00 : f32
    %215 = vector.broadcast %cst_124 : f32 to vector<18x18xf32>
    %216 = arith.select %212, %214, %215 : vector<18x18xi1>, vector<18x18xf32>
    %cst_125 = arith.constant dense<0.000000e+00> : vector<18x18xf32>
    %217 = tpu.matmul %216, %198, %cst_125 {dimension_numbers = #tpu.dot_dimension_numbers<[1], [0], [0], [1], [0, 0, 1, 1], [], []>} : vector<18x18xf32>, vector<18x18xf32>, vector<18x18xf32> -> vector<18x18xf32>
    %c0_126 = arith.constant 0 : index
    %c3_127 = arith.constant 3 : index
    %c0_128 = arith.constant 0 : index
    %c0_129 = arith.constant 0 : index
    %218 = vector.load %arg9[%c0_126, %c3_127, %c0_128, %c0_129] : memref<1x4x18x18xf32, #tpu.memory_space<vmem>>, vector<1x1x18x18xf32>
    %219 = vector.shape_cast %218 : vector<1x1x18x18xf32> to vector<18x18xf32>
    %220 = vector.shape_cast %217 : vector<18x18xf32> to vector<1x1x18x18xf32>
    tpu.vector_store %arg9[%c0_126, %c3_127, %c0_128, %c0_129], %220 {strides = array<i32>} : memref<1x4x18x18xf32, #tpu.memory_space<vmem>>, vector<1x1x18x18xf32>,
    return
  }
  func.func @transform_0(%arg0: i32) -> (i32, i32, i32, i32) {
    %c0_i32 = arith.constant 0 : i32
    %c0_i32_0 = arith.constant 0 : i32
    %c0_i32_1 = arith.constant 0 : i32
    %c0_i32_2 = arith.constant 0 : i32
    return %arg0, %c0_i32, %c0_i32_0, %c0_i32_1 : i32, i32, i32, i32
  }
  func.func @transform_1(%arg0: i32) -> (i32, i32, i32, i32) {
    %c0_i32 = arith.constant 0 : i32
    %c0_i32_0 = arith.constant 0 : i32
    %c0_i32_1 = arith.constant 0 : i32
    %c0_i32_2 = arith.constant 0 : i32
    return %arg0, %c0_i32, %c0_i32_0, %c0_i32_1 : i32, i32, i32, i32
  }
  func.func @transform_2(%arg0: i32) -> (i32, i32) {
    %c0_i32 = arith.constant 0 : i32
    %c0_i32_0 = arith.constant 0 : i32
    %c0_i32_1 = arith.constant 0 : i32
    return %c0_i32, %c0_i32_0 : i32, i32
  }
  func.func @transform_3(%arg0: i32) -> i32 {
    %c0_i32 = arith.constant 0 : i32
    %c0_i32_0 = arith.constant 0 : i32
    return %c0_i32 : i32
  }
  func.func @transform_4(%arg0: i32) -> (i32, i32) {
    %c0_i32 = arith.constant 0 : i32
    %c0_i32_0 = arith.constant 0 : i32
    %c0_i32_1 = arith.constant 0 : i32
    return %c0_i32, %c0_i32_0 : i32, i32
  }
  func.func @transform_5(%arg0: i32) -> i32 {
    %c0_i32 = arith.constant 0 : i32
    %c0_i32_0 = arith.constant 0 : i32
    return %c0_i32 : i32
  }
  func.func @transform_6(%arg0: i32) -> (i32, i32) {
    %c0_i32 = arith.constant 0 : i32
    %c0_i32_0 = arith.constant 0 : i32
    %c0_i32_1 = arith.constant 0 : i32
    return %c0_i32, %c0_i32_0 : i32, i32
  }
  func.func @transform_7(%arg0: i32) -> i32 {
    %c0_i32 = arith.constant 0 : i32
    %c0_i32_0 = arith.constant 0 : i32
    return %c0_i32 : i32
  }
  func.func @transform_8(%arg0: i32) -> (i32, i32, i32, i32) {
    %c0_i32 = arith.constant 0 : i32
    %c0_i32_0 = arith.constant 0 : i32
    %c0_i32_1 = arith.constant 0 : i32
    %c0_i32_2 = arith.constant 0 : i32
    return %arg0, %c0_i32, %c0_i32_0, %c0_i32_1 : i32, i32, i32, i32
  }
}

</mosaic_0001>

<bundles_post_ra>
// kernel: forward.1
= control target key start
LH: loop header
LB: loop body
LE: loop exit
PB: predicated region body
PF: predicated region fallthrough
CT: control target
= control target key end

     0   :  { %14 = vsyncpa [#allocation4], 0  ;;  %s1788_s0 = inlined_call_operand.vmem [shape: f32[1,3,18,18], index: 0, kind: input, shape index: {}]   ;;  %s1789_s1 = inlined_call_operand.vmem [shape: f32[1,4,18,18], index: 1, kind: input, shape index: {}]   ;;  %s1790_s2 = inlined_call_operand.vmem [shape: f32[4,3], index: 2, kind: input, shape index: {}]   ;;  %s1791_s3 = inlined_call_operand.vmem [shape: f32[4], index: 3, kind: input, shape index: {}]   ;;  %s1792_s4 = inlined_call_operand.vmem [shape: f32[1,3], index: 4, kind: input, shape index: {}]   ;;  %s1793_s5 = inlined_call_operand.<no memory space> [shape: f32[1], index: 5, kind: input, shape index: {}]   ;;  %s1794_s6 = inlined_call_operand.vmem [shape: f32[4,3], index: 6, kind: input, shape index: {}]   ;;  %s1795_s7 = inlined_call_operand.vmem [shape: f32[4], index: 7, kind: input, shape index: {}]   ;;  %s1796_s8 = inlined_call_operand.vmem [shape: f32[1,4,18,18], index: 8, kind: output, shape index: {}]  }
   0x1   :  { %15 = vsyncpa [#allocation6], 0  ;;  %s35_s29 = sshll.u32 %s1791_s3, 4  ;;  %s36_s29 = int_to_ptr.vmem [resolvable:$true] %s35_s29 }
   0x2   :  { %16 = vsyncpa [#allocation9], 0  ;;  %s55_s10 = sshll.u32 %s1794_s6, 4  ;;  %s1218_s11 = smov [#allocation5]   ;;  %s56_s10 = int_to_ptr.vmem [resolvable:$true] %s55_s10 }
   0x3   :  { %38 = dma.vmem_to_smem %s36_s29, 16, %s1218_s11, [#allocation6]  }
   0x4   :  { %s1219_s12 = smov [#allocation8]   ;;  %s26_s15 = sshll.u32 %s1790_s2, 4  ;;  %s27_s15 = int_to_ptr.vmem [resolvable:$true] %s26_s15 }
   0x5   :  { %58 = dma.vmem_to_smem %s56_s10, 64, %s1219_s12, [#allocation9]  }
   0x6   :  { %s44_s3 = sshll.u32 %s1792_s4, 4  ;;  %s1220_s18 = smov [#allocation3]   ;;  %s45_s3 = int_to_ptr.vmem [resolvable:$true] %s44_s3 }
   0x7   :  { %29 = dma.vmem_to_smem %s27_s15, 64, %s1220_s18, [#allocation4]  }
   0x8   :  { %s1221_s19 = smov [#allocation7]   ;;  %s64_s21 = sshll.u32 %s1795_s7, 4  ;;  %s65_s21 = int_to_ptr.vmem [resolvable:$true] %s64_s21 }
   0x9   :  { %47 = dma.vmem_to_smem %s45_s3, 16, %s1221_s19, [#allocation6]  }
   0xa   :  { %s1222_s22 = smov [#allocation10]  }
   0xb   :  { %67 = dma.vmem_to_smem %s65_s21, 16, %s1222_s22, [#allocation9]  }
   0xc   :  { %1212 = dma.done.wait [#allocation4], 64  }
   0xd   :  { %1213 = vsyncadd [#allocation4], 4294967232 }
   0xe   :  { %1214 = dma.done.wait [#allocation6], 32  }
   0xf   :  { %1215 = vsyncadd [#allocation6], 4294967264 }
  0x10   :  { %1216 = dma.done.wait [#allocation9], 80  }
  0x11   :  { %1217 = vsyncadd [#allocation9], 4294967216 }
  0x12   :  { %88 = sfence }
  0x13   :  { %s100_s2 = sld [smem:[#allocation7]]  ;;  %v1286_v0 = vld [vmem:[%s1788_s0 + $0x10] sm:$0x3]  ;;  %v1291_v1 = vld [vmem:[%s1788_s0 + $0x8] sm:$0xff]  ;;  %v1296_v2 = vld [vmem:[%s1788_s0] sm:$0xff]  ;;  %v122_v22 = vstv %s1793_s5  ;;  %vm178_vm0 = vcmask 146432  }
  0x14   :  { %s1005_s4 = sld [smem:[#allocation7 + $0x1]]  ;;  %v1301_v3 = vld [vmem:[%s1788_s0 + $0x28] sm:$0x3]  ;;  %v1306_v4 = vld [vmem:[%s1788_s0 + $0x20] sm:$0xff]  ;;  %v1311_v5 = vld [vmem:[%s1788_s0 + $0x18] sm:$0xff]  ;;  %vm229_vm1 = vcmask 140288  }
  0x15   :  { %s1006_s23 = sld [smem:[#allocation7 + $0x2]]  ;;  %v1316_v6 = vld [vmem:[%s1788_s0 + $0x40] sm:$0x3]  ;;  %v1321_v8 = vld [vmem:[%s1788_s0 + $0x38] sm:$0xff]  ;;  %v1331_v16 = vld [vmem:[%s1788_s0 + $0x30] sm:$0xff]  ;;  %vm317_vm2 = vcmask 1041408  }
  0x16   :  { %s126_s24 = sld [smem:[#allocation3]] }
  0x17   :  { %s1007_s30 = sld [smem:[#allocation3 + $0x1]] }
  0x18   :  { %s1008_s15 = sld [smem:[#allocation3 + $0x2]] }
  0x19   :  { %v101_v7 = vstv %s100_s2  ;;  %s147_s22 = sld [smem:[#allocation5]] }
  0x1a   :  { %v104_v9 = vmul.f32 %v101_v7, %v1286_v0  ;;  %v106_v10 = vstv %s1005_s4  ;;  %v103_v11 = vmul.f32 %v101_v7, %v1291_v1  ;;  %v102_v12 = vmul.f32 %v101_v7, %v1296_v2  ;;  %s1021_s5 = sld [smem:[#allocation3 + $0x80]] }
  0x1b   :  { %v109_v13 = vmul.f32 %v1301_v3, %v106_v10  ;;  %v114_v14 = vstv %s1006_s23  ;;  %v108_v15 = vmul.f32 %v1306_v4, %v106_v10  ;;  %v107_v17 = vmul.f32 %v1311_v5, %v106_v10  ;;  %s1022_s2 = sld [smem:[#allocation3 + $0x81]] }
  0x1c   :  { %v117_v18 = vmul.f32 %v1316_v6, %v114_v14  ;;  %v116_v19 = vmul.f32 %v1321_v8, %v114_v14  ;;  %v127_v20 = vstv %s126_s24  ;;  %v115_v25 = vmul.f32 %v1331_v16, %v114_v14  ;;  %s1023_s4 = sld [smem:[#allocation3 + $0x82]] }
  0x1d   :  { %v112_v21 = vadd.f32 %v109_v13, %v104_v9  ;;  %v111_v23 = vadd.f32 %v108_v15, %v103_v11  ;;  %v110_v24 = vadd.f32 %v107_v17, %v102_v12  ;;  %v128_v26 = vmul.f32 %v127_v20, %v1296_v2  ;;  %s1024_s23 = sld [smem:[#allocation5 + $0x1]] }
  0x1e   :  { %v132_v27 = vstv %s1007_s30  ;;  %v140_v31 = vstv %s1008_s15  ;;  %v129_v38 = vmul.f32 %v127_v20, %v1291_v1  ;;  %v130_v46 = vmul.f32 %v127_v20, %v1286_v0  ;;  %s1069_s24 = sld [smem:[#allocation3 + $0x180]] }
  0x1f   :  { %v120_v28 = vadd.f32 %v117_v18, %v112_v21  ;;  %v119_v29 = vadd.f32 %v116_v19, %v111_v23  ;;  %v133_v30 = vmul.f32 %v1311_v5, %v132_v27  ;;  %v141_v34 = vmul.f32 %v1331_v16, %v140_v31  ;;  %s1070_s25 = sld [smem:[#allocation3 + $0x181]] }
  0x20   :  { %v118_v36 = vadd.f32 %v115_v25, %v110_v24  ;;  %v134_v39 = vmul.f32 %v1306_v4, %v132_v27  ;;  %v148_v41 = vstv %s147_s22  ;;  %v142_v44 = vmul.f32 %v1321_v8, %v140_v31  ;;  %s1071_s26 = sld [smem:[#allocation3 + $0x182]] }
  0x21   :  { %v1342_v32 = vadd.f32 %v122_v22, %v120_v28  ;;  %v136_v33 = vadd.f32 %v133_v30, %v128_v26  ;;  %v1347_v35 = vadd.f32 %v122_v22, %v119_v29  ;;  %v135_v47 = vmul.f32 %v1301_v3, %v132_v27  ;;  %s1072_s7 = sld [smem:[#allocation5 + $0x3]] }
  0x22   :  { %v1355_v40 = vadd.f32 %v122_v22, %v118_v36  ;;  %v137_v43 = vadd.f32 %v134_v39, %v129_v38  ;;  %v143_v50 = vmul.f32 %v1316_v6, %v140_v31  ;;  %v351_v59 = vstv %s1021_s5  ;;  %s152_s27 = sld [smem:[#allocation8]] }
  0x23   :  { %1011 = vmatpush.xpose.msk.msra.mxu0 %vm178_vm0, %v1342_v32  ;;  %1029 = vmatpush.xpose.msk.msra.mxu2 %vm178_vm0, %v1342_v32  ;;  %v144_v37 = vadd.f32 %v141_v34, %v136_v33  ;;  %v138_v49 = vadd.f32 %v135_v47, %v130_v46  ;;  %v356_v60 = vstv %s1022_s2  ;;  %v352_v61 = vmul.f32 %v351_v59, %v1296_v2  ;;  %s1009_s28 = sld [smem:[#allocation8 + $0x1]] }
  0x24   :  { %v145_v45 = vadd.f32 %v142_v44, %v137_v43  ;;  %v357_v62 = vmul.f32 %v1311_v5, %v356_v60  ;;  %v364_v63 = vstv %s1023_s4  ;;  %v372_v10 = vstv %s1024_s23  ;;  %s1010_s29 = sld [smem:[#allocation8 + $0x2]] }
  0x25   :  { %v149_v42 = vadd.f32 %v148_v41, %v144_v37  ;;  %v146_v51 = vadd.f32 %v143_v50, %v138_v49  ;;  %v365_v9 = vmul.f32 %v1331_v16, %v364_v63  ;;  %v353_v13 = vmul.f32 %v351_v59, %v1291_v1  ;;  %s173_s30 = sld [smem:[#allocation10]] }
  0x26   :  { %v150_v48 = vadd.f32 %v148_v41, %v145_v45  ;;  %v360_v7 = vadd.f32 %v357_v62, %v352_v61  ;;  %v358_v14 = vmul.f32 %v1306_v4, %v356_v60  ;;  %v366_v15 = vmul.f32 %v1321_v8, %v364_v63  ;;  %s1451_s11 = sld [smem:[#allocation3 + $0x100]] }
  0x27   :  { %1012 = vmatpush.xpose.msk.msra.mxu0 %vm178_vm0, %v1347_v35  ;;  %1030 = vmatpush.xpose.msk.msra.mxu2 %vm178_vm0, %v1347_v35  ;;  %v151_v52 = vadd.f32 %v148_v41, %v146_v51  ;;  %v354_v17 = vmul.f32 %v351_v59, %v1286_v0  ;;  %v359_v18 = vmul.f32 %v1301_v3, %v356_v60  ;;  %v1388_v20 = vstv %s1069_s24  ;;  %s1456_s12 = sld [smem:[#allocation3 + $0x101]] }
  0x28   :  { %v368_v11 = vadd.f32 %v365_v9, %v360_v7  ;;  %v361_v19 = vadd.f32 %v358_v14, %v353_v13  ;;  %v1390_v21 = vstv %s1070_s25  ;;  %v1392_v22 = vstv %s1071_s26  ;;  %s1471_s15 = sld [smem:[#allocation3 + $0x102]] }
  0x29   :  { %v780_v23 = vmul.f32 %v1388_v20, %v1296_v2  ;;  %v785_v24 = vmul.f32 %v1311_v5, %v1390_v21  ;;  %v793_v25 = vmul.f32 %v1331_v16, %v1392_v22  ;;  %v362_v28 = vadd.f32 %v359_v18, %v354_v17  ;;  %s1048_s3 = sld [smem:[#allocation5 + $0x2]] }
  0x2a   :  { %v373_v12 = vadd.f32 %v372_v10, %v368_v11  ;;  %v369_v27 = vadd.f32 %v366_v15, %v361_v19  ;;  %v367_v29 = vmul.f32 %v1316_v6, %v364_v63  ;;  %v1401_v34 = vstv %s1072_s7  ;;  %s1025_s5 = sld [smem:[#allocation8 + $0x80]] }
  0x2b   :  { %1013 = vmatpush.xpose.msk.msra.mxu0 %vm178_vm0, %v1355_v40  ;;  %1031 = vmatpush.xpose.msk.msra.mxu2 %vm178_vm0, %v1355_v40  ;;  %v788_v31 = vadd.f32 %v785_v24, %v780_v23  ;;  %v174_v11 = vstv %s173_s30  ;;  %s1026_s2 = sld [smem:[#allocation8 + $0x81]] }
  0x2c   :  { %v374_v33 = vadd.f32 %v372_v10, %v369_v27  ;;  %v370_v38 = vadd.f32 %v367_v29, %v362_v28  ;;  %s1027_s4 = sld [smem:[#allocation8 + $0x82]] }
  0x2d   :  { %v796_v37 = vadd.f32 %v793_v25, %v788_v31  ;;  %s1028_s23 = sld [smem:[#allocation10 + $0x1]] }
  0x2e   :  { %1014 = vmatmul.msk.f32.vlgmr.msra.gmra.mxu0 %vm178_vm0, %v149_v42  ;;  %1032 = vmatmul.msk.f32.vlgmr.msra.gmra.mxu2 %vm178_vm0, %v373_v12  ;;  %v375_v42 = vadd.f32 %v372_v10, %v370_v38  ;;  %s1073_s24 = sld [smem:[#allocation8 + $0x180]] }
  0x2f   :  { %1077 = vmatpush.xpose.msk.msrb.mxu0 %vm178_vm0, %v1342_v32  ;;  %v801_v39 = vadd.f32 %v1401_v34, %v796_v37  ;;  %s1074_s25 = sld [smem:[#allocation8 + $0x181]] }
  0x30   :  { %s1075_s26 = sld [smem:[#allocation8 + $0x182]] }
  0x31   :  { %s1076_s7 = sld [smem:[#allocation10 + $0x3]] }
  0x32   :  { %s1613_s30 = sld [smem:[#allocation10 + $0x2]] }
  0x33   :  { %1078 = vmatpush.xpose.msk.msrb.mxu0 %vm178_vm0, %v1347_v35 }
  0x36   :  { %1015 = vmatmul.msk.f32.gmra.mxu0 %vm178_vm0, %v150_v48  ;;  %1033 = vmatmul.msk.f32.gmra.mxu2 %vm178_vm0, %v374_v33 }
  0x37   :  { %1079 = vmatpush.xpose.msk.msrb.mxu0 %vm178_vm0, %v1355_v40 }
  0x3e   :  { %1016 = vmatmul.msk.f32.gmra.mxu0 %vm178_vm0, %v151_v52  ;;  %1034 = vmatmul.msk.f32.gmra.mxu2 %vm178_vm0, %v375_v42 }
  0x46   :  { %1080 = vmatmul.msk.f32.vlgmr.msrb.gmra.mxu0 %vm178_vm0, %v801_v39  ;;  %v296_v39 = vld [vmem:[%s1789_s1] sm:$0xff] }
  0x47   :  { %vm299_vm7 = vcmp.ge.f32.partialorder %v296_v39, 0.8 }
  0xab   :  { %v214_v53 = vpop.f32.mrf.mxu0 }
  0xac   :  { %v223_v54 = vsel %vm178_vm0, %v214_v53, -inf }
  0xad   :  { %224 = vmax.xlane.f32.xlu0 %v223_v54  ;;  %v153_v54 = vstv %s152_s27  ;;  %s1588_s27 = sld [smem:[#allocation8 + $0x100]] }
  0xae   :  { %v155_v61 = vmul.f32 %v153_v54, %v1291_v1  ;;  %v154_v10 = vmul.f32 %v153_v54, %v1296_v2 }
  0xb1   :  { %v1433_v24 = vpop.f32.mrf.mxu2 }
  0xb3   :  { %v217_v55 = vpop.f32.mrf.mxu0 }
  0xb4   :  { %v226_v56 = vsel %vm178_vm0, %v217_v55, -inf }
  0xb5   :  { %227 = vmax.xlane.f32.xlu0 %v226_v56  ;;  %v156_v56 = vmul.f32 %v153_v54, %v1286_v0  ;;  %v781_v54 = vmul.f32 %v1388_v20, %v1291_v1 }
  0xb9   :  { %v1439_v28 = vpop.f32.mrf.mxu2 }
  0xbb   :  { %v220_v57 = vpop.f32.mrf.mxu0 }
  0xbc   :  { %v230_v58 = vsel %vm229_vm1, %v220_v57, -inf }
  0xbd   :  { %231 = vmax.xlane.f32.xlu1 %v230_v58  ;;  %v166_v58 = vstv %s1010_s29  ;;  %s1051_s29 = sld [smem:[#allocation8 + $0x102]] }
  0xbe   :  { %v169_v60 = vmul.f32 %v1316_v6, %v166_v58  ;;  %v168_v9 = vmul.f32 %v1321_v8, %v166_v58  ;;  %v167_v15 = vmul.f32 %v1331_v16, %v166_v58 }
 0x120   :  { %v225_v26 = vpop.xlane.xlu0 %224 }
 0x121   :  { %v233_v30 = vsub.f32 %v214_v53, %v225_v26  ;;  %v437_v26 = vsel %vm178_vm0, %v1433_v24, -inf }
 0x122   :  { %438 = vmax.xlane.f32.xlu0 %v437_v26 }
 0x123   :  { %v236_v36 = vmul.f32 1.442695, %v233_v30 }
 0x125   :  { %1098 = vpow2.f32 %v236_v36 }
 0x128   :  { %v228_v41 = vpop.xlane.xlu0 %227 }
 0x129   :  { %v234_v43 = vsub.f32 %v217_v55, %v228_v41  ;;  %v158_v55 = vstv %s1009_s28  ;;  %v1446_v41 = vpop.f32.mrf.mxu2  ;;  %s1593_s28 = sld [smem:[#allocation8 + $0x101]] }
 0x12a   :  { %v160_v62 = vmul.f32 %v1306_v4, %v158_v55  ;;  %v159_v12 = vmul.f32 %v1311_v5, %v158_v55 }
 0x12b   :  { %v1406_v44 = vpop.eup %1098  ;;  %v238_v45 = vmul.f32 1.442695, %v234_v43 }
 0x12c   :  { %v242_v46 = vsel %vm178_vm0, %v1406_v44, 0.0  ;;  %v163_v7 = vadd.f32 %v160_v62, %v155_v61  ;;  %v162_v17 = vadd.f32 %v159_v12, %v154_v10  ;;  %v297_v61 = vld [vmem:[%s1789_s1 + $0x8] sm:$0xff] }
 0x12d   :  { %1100 = vpow2.f32 %v238_v45  ;;  %243 = vadd.xlane.f32.xlu1 %v242_v46  ;;  %vm300_vm12 = vcmp.ge.f32.partialorder %v297_v61, 0.8 }
 0x12e   :  { %v171_v14 = vadd.f32 %v168_v9, %v163_v7  ;;  %v170_v19 = vadd.f32 %v167_v15, %v162_v17  ;;  %v1468_v7 = vpop.f32.mrf.mxu0 }
 0x12f   :  { %v865_v12 = vsel %vm178_vm0, %v1468_v7, -inf }
 0x130   :  { %v232_v47 = vpop.xlane.xlu1 %231  ;;  %v176_v18 = vadd.f32 %v174_v11, %v171_v14  ;;  %v175_v23 = vadd.f32 %v174_v11, %v170_v19  ;;  %v565_v14 = vstv %s1451_s11  ;;  %v782_v19 = vmul.f32 %v1388_v20, %v1286_v0 }
 0x131   :  { %v235_v48 = vsub.f32 %v220_v57, %v232_v47  ;;  %v161_v57 = vmul.f32 %v1301_v3, %v158_v55  ;;  %v786_v55 = vmul.f32 %v1306_v4, %v1390_v21 }
 0x133   :  { %v1411_v49 = vpop.eup %1100  ;;  %v240_v50 = vmul.f32 1.442695, %v235_v48  ;;  %v164_v59 = vadd.f32 %v161_v57, %v156_v56  ;;  %v789_v58 = vadd.f32 %v786_v55, %v781_v54 }
 0x134   :  { %v245_v51 = vsel %vm178_vm0, %v1411_v49, 0.0 }
 0x135   :  { %1102 = vpow2.f32 %v240_v50  ;;  %246 = vadd.xlane.f32.xlu2 %v245_v51  ;;  %v172_v63 = vadd.f32 %v169_v60, %v164_v59  ;;  %v443_v50 = vsel %vm229_vm1, %v1446_v41, -inf }
 0x137   :  { %v177_v13 = vadd.f32 %v174_v11, %v172_v63 }
 0x139   :  { %1017 = vmatpush.msk.msra.mxu1 %vm317_vm2, %v177_v13 }
 0x13b   :  { %v1415_v52 = vpop.eup %1102  ;;  %335 = vmatpush.msra.mxu1 %v176_v18 }
 0x13c   :  { %v248_v53 = vsel %vm229_vm1, %v1415_v52, 0.0 }
 0x13d   :  { %249 = vadd.xlane.f32.xlu2 %v248_v53  ;;  %336 = vmatpush.msra.mxu1 %v175_v23  ;;  %v787_v23 = vmul.f32 %v1301_v3, %v1390_v21 }
 0x13f   :  { %1053 = vmatpush.xpose.msk.msrb.mxu1 %vm178_vm0, %v1342_v32  ;;  %v440_v32 = vsel %vm178_vm0, %v1439_v28, -inf }
 0x140   :  { %441 = vmax.xlane.f32.xlu1 %v440_v32  ;;  %v790_v32 = vadd.f32 %v787_v23, %v782_v19 }
 0x143   :  { %1054 = vmatpush.xpose.msk.msrb.mxu1 %vm178_vm0, %v1347_v35 }
 0x145   :  { %444 = vmax.xlane.f32.xlu2 %v443_v50  ;;  %v567_v50 = vmul.f32 %v565_v14, %v1291_v1 }
 0x147   :  { %1055 = vmatpush.xpose.msk.msrb.mxu1 %vm178_vm0, %v1355_v40 }
 0x148   :  { %866 = vmax.xlane.f32.xlu1 %v865_v12 }
 0x1a0   :  { %v244_v25 = vpop.xlane.xlu1 %243 }
 0x1a1   :  { %1104 = vrcp.f32 %v244_v25  ;;  %v262_v31 = vand.u32 2147483648, %v244_v25  ;;  %v260_v36 = vand.u32 2147483647, %v244_v25  ;;  %vm256_vm4 = vweird.f32 %v244_v25 }
 0x1a3   :  { %v263_v38 = vor.u32 1.1754944e-38, %v262_v31  ;;  %vm261_vm6 = vcmp.eq.f32.partialorder %v260_v36, 8.507059e+37 }
 0x1a7   :  { %v1105_v27 = vpop.eup %1104 }
 0x1a8   :  { %v252_v29 = vmul.f32 %v1105_v27, %v244_v25  ;;  %v247_v30 = vpop.xlane.xlu2 %246  ;;  %vm257_vm3 = vweird.f32 %v1105_v27 }
 0x1a9   :  { %1106 = vrcp.f32 %v247_v30  ;;  %vm258_vm5 = vmor %vm256_vm4, %vm257_vm3  ;;  %v277_v51 = vand.u32 2147483648, %v247_v30  ;;  %v275_v53 = vand.u32 2147483647, %v247_v30  ;;  %vm271_vm9 = vweird.f32 %v247_v30 }
 0x1aa   :  { %v253_v35 = vsub.f32 1.0, %v252_v29  ;;  %v795_v29 = vmul.f32 %v1316_v6, %v1392_v22 }
 0x1ab   :  { %v278_v63 = vor.u32 1.1754944e-38, %v277_v51  ;;  %vm276_vm11 = vcmp.eq.f32.partialorder %v275_v53, 8.507059e+37  ;;  %v586_v53 = vstv %s1048_s3 }
 0x1ac   :  { %v254_v33 = vmul.f32 %v1105_v27, %v253_v35  ;;  %v798_v35 = vadd.f32 %v795_v29, %v790_v32 }
 0x1ae   :  { %v255_v37 = vadd.f32 %v1105_v27, %v254_v33  ;;  %v566_v33 = vmul.f32 %v565_v14, %v1296_v2 }
 0x1af   :  { %v1107_v40 = vpop.eup %1106 }
 0x1b0   :  { %v267_v42 = vmul.f32 %v1107_v40, %v247_v30  ;;  %v1448_v43 = vpop.xlane.xlu2 %249  ;;  %v259_v45 = vsel %vm258_vm5, %v1105_v27, %v255_v37  ;;  %vm272_vm8 = vweird.f32 %v1107_v40  ;;  %v570_v27 = vstv %s1456_s12  ;;  %v298_v37 = vld [vmem:[%s1789_s1 + $0x10] sm:$0x3] }
 0x1b1   :  { %1108 = vrcp.f32 %v1448_v43  ;;  %v264_v46 = vsel %vm261_vm6, %v263_v38, %v259_v45  ;;  %vm273_vm10 = vmor %vm271_vm9, %vm272_vm8  ;;  %v292_v25 = vand.u32 2147483648, %v1448_v43  ;;  %v290_v26 = vand.u32 2147483647, %v1448_v43 }
 0x1b2   :  { %v268_v47 = vsub.f32 1.0, %v267_v42  ;;  %v265_v48 = vmul.f32 %v1406_v44, %v264_v46  ;;  %v794_v44 = vmul.f32 %v1321_v8, %v1392_v22  ;;  %vm286_vm14 = vweird.f32 %v1448_v43 }
 0x1b3   :  { %v293_v31 = vor.u32 1.1754944e-38, %v292_v25  ;;  %v571_v36 = vmul.f32 %v1311_v5, %v570_v27  ;;  %vm291_vm3 = vcmp.eq.f32.partialorder %v290_v26, 8.507059e+37  ;;  %v803_v38 = vadd.f32 %v1401_v34, %v798_v35 }
 0x1b4   :  { %v269_v56 = vmul.f32 %v1107_v40, %v268_v47  ;;  %v302_v57 = vmul.f32 5.0, %v265_v48  ;;  %v797_v9 = vadd.f32 %v794_v44, %v789_v58  ;;  %vm301_vm4 = vcmp.ge.f32.partialorder %v298_v37, 0.8 }
 0x1b5   :  { %v572_v51 = vmul.f32 %v1306_v4, %v570_v27 }
 0x1b6   :  { %v305_v59 = vsel %vm299_vm7, %v302_v57, 0.0  ;;  %v270_v60 = vadd.f32 %v1107_v40, %v269_v56  ;;  %v802_v15 = vadd.f32 %v1401_v34, %v797_v9  ;;  %v568_v56 = vmul.f32 %v565_v14, %v1286_v0 }
 0x1b7   :  { %v1109_v62 = vpop.eup %1108  ;;  %1018 = vmatmul.msk.f32.vlgmr.msra.gmra.mxu1 %vm178_vm0, %v305_v59  ;;  %v575_v54 = vadd.f32 %v572_v51, %v567_v50  ;;  %v573_v57 = vmul.f32 %v1301_v3, %v570_v27 }
 0x1b8   :  { %v282_v10 = vmul.f32 %v1109_v62, %v1448_v43  ;;  %v274_v11 = vsel %vm273_vm10, %v1107_v40, %v270_v60  ;;  %1081 = vmatmul.msk.f32.gmra.mxu0 %vm178_vm0, %v802_v15  ;;  %vm287_vm13 = vweird.f32 %v1109_v62  ;;  %v578_v40 = vstv %s1471_s15 }
 0x1b9   :  { %v279_v13 = vsel %vm276_vm11, %v278_v63, %v274_v11  ;;  %vm288_vm15 = vmor %vm286_vm14, %vm287_vm13  ;;  %v574_v43 = vadd.f32 %v571_v36, %v566_v33  ;;  %v579_v45 = vmul.f32 %v1331_v16, %v578_v40  ;;  %v576_v58 = vadd.f32 %v573_v57, %v568_v56 }
 0x1ba   :  { %v283_v17 = vsub.f32 1.0, %v282_v10  ;;  %v280_v18 = vmul.f32 %v1411_v49, %v279_v13  ;;  %v581_v59 = vmul.f32 %v1316_v6, %v578_v40  ;;  %v439_v10 = vpop.xlane.xlu0 %438  ;;  %v398_v56 = vstv %s1028_s23 }
 0x1bb   :  { %v582_v48 = vadd.f32 %v579_v45, %v574_v43  ;;  %v446_v11 = vsub.f32 %v1433_v24, %v439_v10  ;;  %v390_v45 = vstv %s1027_s4 }
 0x1bc   :  { %v284_v30 = vmul.f32 %v1109_v62, %v283_v17  ;;  %v303_v49 = vmul.f32 5.0, %v280_v18  ;;  %v584_v60 = vadd.f32 %v581_v59, %v576_v58  ;;  %v445_v17 = vpop.xlane.xlu2 %444  ;;  %v442_v18 = vpop.xlane.xlu1 %441  ;;  %v391_v59 = vmul.f32 %v1331_v16, %v390_v45 }
 0x1bd   :  { %v587_v34 = vadd.f32 %v586_v53, %v582_v48  ;;  %v449_v15 = vmul.f32 1.442695, %v446_v11  ;;  %v448_v23 = vsub.f32 %v1446_v41, %v445_v17  ;;  %v447_v24 = vsub.f32 %v1439_v28, %v442_v18 }
 0x1be   :  { %v306_v20 = vsel %vm300_vm12, %v303_v49, 0.0  ;;  %v285_v21 = vadd.f32 %v1109_v62, %v284_v30  ;;  %v589_v61 = vadd.f32 %v586_v53, %v584_v60 }
 0x1bf   :  { %1019 = vmatmul.msk.f32.gmra.mxu1 %vm178_vm0, %v306_v20  ;;  %1110 = vpow2.f32 %v449_v15  ;;  %v453_v27 = vmul.f32 1.442695, %v448_v23  ;;  %v451_v30 = vmul.f32 1.442695, %v447_v24  ;;  %v810_v23 = vstv %s1074_s25 }
 0x1c0   :  { %v289_v22 = vsel %vm288_vm15, %v1109_v62, %v285_v21  ;;  %1082 = vmatmul.msk.f32.gmra.mxu0 %vm178_vm0, %v803_v38  ;;  %v377_v38 = vstv %s1025_s5 }
 0x1c1   :  { %v294_v39 = vsel %vm291_vm3, %v293_v31, %v289_v22  ;;  %1112 = vpow2.f32 %v453_v27  ;;  %v379_v48 = vmul.f32 %v377_v38, %v1291_v1  ;;  %v813_v27 = vmul.f32 %v1301_v3, %v810_v23 }
 0x1c2   :  { %v295_v42 = vmul.f32 %v1415_v52, %v294_v39  ;;  %v580_v52 = vmul.f32 %v1321_v8, %v578_v40  ;;  %1114 = vpow2.f32 %v451_v30  ;;  %v382_v39 = vstv %s1026_s2 }
 0x1c3   :  { %v385_v43 = vmul.f32 %v1301_v3, %v382_v39  ;;  %v384_v50 = vmul.f32 %v1306_v4, %v382_v39  ;;  %v383_v57 = vmul.f32 %v1311_v5, %v382_v39  ;;  %v818_v30 = vstv %s1075_s26 }
 0x1c4   :  { %v304_v46 = vmul.f32 5.0, %v295_v42  ;;  %v583_v55 = vadd.f32 %v580_v52, %v575_v54  ;;  %v867_v32 = vpop.xlane.xlu1 %866  ;;  %v380_v42 = vmul.f32 %v377_v38, %v1286_v0  ;;  %v392_v54 = vmul.f32 %v1321_v8, %v390_v45 }
 0x1c5   :  { %v1540_v49 = vpop.eup %1110  ;;  %v874_v28 = vsub.f32 %v1468_v7, %v867_v32  ;;  %v378_v52 = vmul.f32 %v377_v38, %v1296_v2 }
 0x1c6   :  { %v307_v47 = vsel %vm301_vm4, %v304_v46, 0.0  ;;  %v588_v44 = vadd.f32 %v586_v53, %v583_v55  ;;  %v455_v21 = vsel %vm178_vm0, %v1540_v49, 0.0  ;;  %v388_v46 = vadd.f32 %v385_v43, %v380_v42 }
 0x1c7   :  { %1020 = vmatmul.msk.f32.gmra.mxu1 %vm178_vm0, %v307_v47  ;;  %v877_v31 = vmul.f32 1.442695, %v874_v28  ;;  %v1551_v33 = vpop.eup %1112  ;;  %v393_v47 = vmul.f32 %v1316_v6, %v390_v45  ;;  %v819_v45 = vmul.f32 %v1331_v16, %v818_v30 }
 0x1c8   :  { %v1553_v36 = vpop.eup %1114  ;;  %v461_v22 = vsel %vm229_vm1, %v1551_v33, 0.0 }
 0x1c9   :  { %1116 = vpow2.f32 %v877_v31  ;;  %v458_v7 = vsel %vm178_vm0, %v1553_v36, 0.0  ;;  %v396_v53 = vadd.f32 %v393_v47, %v388_v46  ;;  %v826_v31 = vstv %s1076_s7 }
 0x1cf   :  { %1056 = vmatmul.msk.f32.vlgmr.msrb.gmra.mxu1 %vm178_vm0, %v587_v34  ;;  %v1559_v37 = vpop.eup %1116  ;;  %v387_v34 = vadd.f32 %v384_v50, %v379_v48 }
 0x1d0   :  { %v883_v40 = vsel %vm178_vm0, %v1559_v37, 0.0 }
 0x1d1   :  { %v395_v58 = vadd.f32 %v392_v54, %v387_v34  ;;  %v1611_v34 = vstv %s1588_s27 }
 0x1d7   :  { %1057 = vmatmul.msk.f32.gmra.mxu1 %vm178_vm0, %v588_v44  ;;  %v401_v44 = vadd.f32 %v398_v56, %v396_v53 }
 0x1d9   :  { %1038 = vmatpush.msk.msra.mxu3 %vm317_vm2, %v401_v44 }
 0x1df   :  { %1058 = vmatmul.msk.f32.gmra.mxu1 %vm178_vm0, %v589_v61  ;;  %v386_v61 = vadd.f32 %v383_v57, %v378_v52 }
 0x234   :  { %v338_v62 = vpop.f32.mrf.mxu1 }
 0x235   :  { %347 = vst.msk [vmem:[%s1796_s8] sm:$0xff] %vm178_vm0, %v338_v62  ;;  %v1528_v14 = vpop.f32.mrf.mxu0  ;;  %v400_v62 = vadd.f32 %v398_v56, %v395_v58 }
 0x236   :  { %v868_v19 = vsel %vm178_vm0, %v1528_v14, -inf }
 0x237   :  { %548 = vmatpush.msra.mxu3 %v400_v62 }
 0x23c   :  { %v341_v63 = vpop.f32.mrf.mxu1 }
 0x23d   :  { %348 = vst.msk [vmem:[%s1796_s8 + $0x8] sm:$0xff] %vm178_vm0, %v341_v63  ;;  %v1538_v29 = vpop.f32.mrf.mxu0  ;;  %v394_v63 = vadd.f32 %v391_v59, %v386_v61  ;;  %v594_v59 = vmul.f32 %v1611_v34, %v1286_v0 }
 0x23e   :  { %v871_v20 = vsel %vm229_vm1, %v1538_v29, -inf }
 0x244   :  { %v344_v9 = vpop.f32.mrf.mxu1 }
 0x245   :  { %349 = vst.msk [vmem:[%s1796_s8 + $0x10] sm:$0x3] %vm229_vm1, %v344_v9  ;;  %v399_v9 = vadd.f32 %v398_v56, %v394_v63 }
 0x247   :  { %549 = vmatpush.msra.mxu3 %v399_v9 }
 0x24c   :  { %v1524_v12 = vpop.f32.mrf.mxu1 }
 0x24d   :  { %v651_v13 = vsel %vm178_vm0, %v1524_v12, -inf }
 0x24e   :  { %652 = vmax.xlane.f32.xlu0 %v651_v13 }
 0x254   :  { %v1533_v25 = vpop.f32.mrf.mxu1 }
 0x255   :  { %v654_v26 = vsel %vm178_vm0, %v1533_v25, -inf }
 0x256   :  { %869 = vmax.xlane.f32.xlu0 %v868_v19  ;;  %655 = vmax.xlane.f32.xlu2 %v654_v26  ;;  %v805_v19 = vstv %s1073_s24 }
 0x257   :  { %v808_v26 = vmul.f32 %v805_v19, %v1286_v0  ;;  %v807_v32 = vmul.f32 %v805_v19, %v1291_v1  ;;  %v806_v38 = vmul.f32 %v805_v19, %v1296_v2 }
 0x25c   :  { %v1544_v41 = vpop.f32.mrf.mxu1 }
 0x25d   :  { %v657_v35 = vsel %vm229_vm1, %v1544_v41, -inf }
 0x25e   :  { %456 = vadd.xlane.f32.xlu0 %v455_v21  ;;  %872 = vmax.xlane.f32.xlu2 %v871_v20  ;;  %v812_v20 = vmul.f32 %v1306_v4, %v810_v23 }
 0x25f   :  { %658 = vmax.xlane.f32.xlu1 %v657_v35 }
 0x260   :  { %v815_v39 = vadd.f32 %v812_v20, %v807_v32 }
 0x266   :  { %462 = vadd.xlane.f32.xlu2 %v461_v22  ;;  %v820_v22 = vmul.f32 %v1321_v8, %v818_v30  ;;  %v811_v8 = vmul.f32 %v1311_v5, %v810_v23 }
 0x267   :  { %459 = vadd.xlane.f32.xlu1 %v458_v7 }
 0x268   :  { %v823_v2 = vadd.f32 %v820_v22, %v815_v39  ;;  %v814_v48 = vadd.f32 %v811_v8, %v806_v38 }
 0x26a   :  { %v828_v5 = vadd.f32 %v826_v31, %v823_v2  ;;  %v822_v50 = vadd.f32 %v819_v45, %v814_v48 }
 0x26c   :  { %v827_v52 = vadd.f32 %v826_v31, %v822_v50 }
 0x26f   :  { %884 = vadd.xlane.f32.xlu1 %v883_v40 }
 0x2c1   :  { %v653_v51 = vpop.xlane.xlu0 %652 }
 0x2c2   :  { %v660_v55 = vsub.f32 %v1524_v12, %v653_v51 }
 0x2c4   :  { %v663_v60 = vmul.f32 1.442695, %v660_v55  ;;  %v1619_v55 = vstv %s1593_s28 }
 0x2c5   :  { %v599_v63 = vmul.f32 %v1301_v3, %v1619_v55 }
 0x2c6   :  { %1118 = vpow2.f32 %v663_v60 }
 0x2c9   :  { %v870_v10 = vpop.xlane.xlu0 %869  ;;  %v656_v11 = vpop.xlane.xlu2 %655 }
 0x2ca   :  { %v875_v12 = vsub.f32 %v1528_v14, %v870_v10  ;;  %v661_v13 = vsub.f32 %v1533_v25, %v656_v11  ;;  %v816_v14 = vadd.f32 %v813_v27, %v808_v26  ;;  %v821_v25 = vmul.f32 %v1316_v6, %v818_v30 }
 0x2cb   :  { %v1636_v10 = vstv %s1051_s29  ;;  %v602_v11 = vadd.f32 %v599_v63, %v594_v59 }
 0x2cc   :  { %v1576_v15 = vpop.eup %1118  ;;  %v879_v17 = vmul.f32 1.442695, %v875_v12  ;;  %v665_v18 = vmul.f32 1.442695, %v661_v13  ;;  %v824_v35 = vadd.f32 %v821_v25, %v816_v14  ;;  %v607_v12 = vmul.f32 %v1316_v6, %v1636_v10  ;;  %v1035_v14 = vld [vmem:[%s1789_s1 + $0x18] sm:$0xff] }
 0x2cd   :  { %v669_v24 = vsel %vm178_vm0, %v1576_v15, 0.0  ;;  %vm513_vm10 = vcmp.ge.f32.partialorder %v1035_v14, 0.8 }
 0x2ce   :  { %1120 = vpow2.f32 %v879_v17  ;;  %670 = vadd.xlane.f32.xlu0 %v669_v24  ;;  %v829_v4 = vadd.f32 %v826_v31, %v824_v35  ;;  %v610_v23 = vadd.f32 %v607_v12, %v602_v11  ;;  %v1643_v24 = vstv %s1613_s30  ;;  %v1146_v12 = vld [vmem:[%s1788_s0 + $0x8] sm:$0xff] }
 0x2cf   :  { %1122 = vpow2.f32 %v665_v18 }
 0x2d0   :  { %1086 = vmatpush.msk.msrb.mxu2 %vm317_vm2, %v829_v4  ;;  %v615_v20 = vadd.f32 %v1643_v24, %v610_v23  ;;  %v1149_v23 = vld [vmem:[%s1788_s0] sm:$0xff] }
 0x2d1   :  { %v1585_v28 = vpop.xlane.xlu0 %456  ;;  %v873_v21 = vpop.xlane.xlu2 %872 }
 0x2d2   :  { %1124 = vrcp.f32 %v1585_v28  ;;  %v876_v7 = vsub.f32 %v1538_v29, %v873_v21  ;;  %v659_v40 = vpop.xlane.xlu1 %658  ;;  %976 = vmatpush.msrb.mxu2 %v828_v5  ;;  %v475_v44 = vand.u32 2147483648, %v1585_v28  ;;  %v473_v58 = vand.u32 2147483647, %v1585_v28  ;;  %1062 = vmatpush.msk.msrb.mxu3 %vm317_vm2, %v615_v20 }
 0x2d3   :  { %v662_v1 = vsub.f32 %v1544_v41, %v659_v40  ;;  %vm469_vm6 = vweird.f32 %v1585_v28 }
 0x2d4   :  { %v1596_v42 = vpop.eup %1120  ;;  %v881_v43 = vmul.f32 1.442695, %v876_v7  ;;  %977 = vmatpush.msrb.mxu2 %v827_v52  ;;  %v476_v17 = vor.u32 1.1754944e-38, %v475_v44  ;;  %vm474_vm8 = vcmp.eq.f32.partialorder %v473_v58, 8.507059e+37 }
 0x2d5   :  { %v1600_v46 = vpop.eup %1122  ;;  %v667_v47 = vmul.f32 1.442695, %v662_v1  ;;  %v886_v29 = vsel %vm178_vm0, %v1596_v42, 0.0 }
 0x2d6   :  { %1126 = vpow2.f32 %v881_v43  ;;  %887 = vadd.xlane.f32.xlu0 %v886_v29  ;;  %v672_v41 = vsel %vm178_vm0, %v1600_v46, 0.0 }
 0x2d7   :  { %1128 = vpow2.f32 %v667_v47  ;;  %673 = vadd.xlane.f32.xlu2 %v672_v41  ;;  %v1036_v47 = vld [vmem:[%s1789_s1 + $0x20] sm:$0xff] }
 0x2d8   :  { %v1125_v16 = vpop.eup %1124  ;;  %vm514_vm4 = vcmp.ge.f32.partialorder %v1036_v47, 0.8 }
 0x2d9   :  { %v465_v51 = vmul.f32 %v1125_v16, %v1585_v28  ;;  %v1608_v53 = vpop.xlane.xlu2 %462  ;;  %vm470_vm5 = vweird.f32 %v1125_v16 }
 0x2da   :  { %1130 = vrcp.f32 %v1608_v53  ;;  %v1616_v54 = vpop.xlane.xlu1 %459  ;;  %vm471_vm7 = vmor %vm469_vm6, %vm470_vm5  ;;  %vm499_vm12 = vweird.f32 %v1608_v53  ;;  %v505_v7 = vand.u32 2147483648, %v1608_v53  ;;  %v503_v4 = vand.u32 2147483647, %v1608_v53 }
 0x2db   :  { %v466_v56 = vsub.f32 1.0, %v465_v51  ;;  %1132 = vrcp.f32 %v1616_v54  ;;  %v490_v21 = vand.u32 2147483648, %v1616_v54  ;;  %v488_v22 = vand.u32 2147483647, %v1616_v54 }
 0x2dc   :  { %v1622_v57 = vpop.eup %1126  ;;  %vm484_vm14 = vweird.f32 %v1616_v54  ;;  %v506_v2 = vor.u32 1.1754944e-38, %v505_v7  ;;  %vm504_vm3 = vcmp.eq.f32.partialorder %v503_v4, 8.507059e+37 }
 0x2dd   :  { %v1628_v60 = vpop.eup %1128  ;;  %v467_v61 = vmul.f32 %v1125_v16, %v466_v56  ;;  %v889_v62 = vsel %vm229_vm1, %v1622_v57, 0.0  ;;  %v491_v43 = vor.u32 1.1754944e-38, %v490_v21  ;;  %vm489_vm2 = vcmp.eq.f32.partialorder %v488_v22, 8.507059e+37 }
 0x2de   :  { %v675_v9 = vsel %vm229_vm1, %v1628_v60, 0.0 }
 0x2df   :  { %890 = vadd.xlane.f32.xlu2 %v889_v62  ;;  %676 = vadd.xlane.f32.xlu1 %v675_v9  ;;  %v468_v0 = vadd.f32 %v1125_v16, %v467_v61  ;;  %v1083_v61 = vld [vmem:[%s1789_s1 + $0x48] sm:$0xff] }
 0x2e0   :  { %v1131_v13 = vpop.eup %1130 }
 0x2e1   :  { %v1133_v3 = vpop.eup %1132  ;;  %v495_v18 = vmul.f32 %v1131_v13, %v1608_v53  ;;  %v472_v19 = vsel %vm471_vm7, %v1125_v16, %v468_v0  ;;  %vm500_vm9 = vweird.f32 %v1131_v13 }
 0x2e2   :  { %v480_v26 = vmul.f32 %v1133_v3, %v1616_v54  ;;  %v885_v27 = vpop.xlane.xlu1 %884  ;;  %v477_v30 = vsel %vm474_vm8, %v476_v17, %v472_v19  ;;  %vm485_vm11 = vweird.f32 %v1133_v3  ;;  %vm1656_vm13 = vmor %vm499_vm12, %vm500_vm9  ;;  %v1147_v17 = vld [vmem:[%s1788_s0 + $0x20] sm:$0xff] }
 0x2e3   :  { %v496_v6 = vsub.f32 1.0, %v495_v18  ;;  %1134 = vrcp.f32 %v885_v27  ;;  %v478_v32 = vmul.f32 %v1540_v49, %v477_v30  ;;  %vm486_vm15 = vmor %vm484_vm14, %vm485_vm11  ;;  %v903_v16 = vand.u32 2147483648, %v885_v27 }
 0x2e4   :  { %v481_v25 = vsub.f32 1.0, %v480_v26  ;;  %v901_v53 = vand.u32 2147483647, %v885_v27  ;;  %vm897_vm6 = vweird.f32 %v885_v27  ;;  %v592_v26 = vmul.f32 %v1149_v23, %v1611_v34 }
 0x2e5   :  { %v497_v28 = vmul.f32 %v1131_v13, %v496_v6  ;;  %v516_v31 = vmul.f32 5.0, %v478_v32  ;;  %v904_v58 = vor.u32 1.1754944e-38, %v903_v16 }
 0x2e6   :  { %v482_v35 = vmul.f32 %v1133_v3, %v481_v25  ;;  %vm902_vm8 = vcmp.eq.f32.partialorder %v901_v53, 8.507059e+37  ;;  %v1151_v25 = vld [vmem:[%s1788_s0 + $0x30] sm:$0xff] }
 0x2e7   :  { %v498_v40 = vadd.f32 %v1131_v13, %v497_v28  ;;  %v519_v38 = vsel %vm513_vm10, %v516_v31, 0.0  ;;  %vm941_vm10 = vcmp.ge.f32.partialorder %v1083_v61, 0.8  ;;  %v605_v32 = vmul.f32 %v1151_v25, %v1636_v10 }
 0x2e8   :  { %v483_v1 = vadd.f32 %v1133_v3, %v482_v35  ;;  %1039 = vmatmul.msk.f32.vlgmr.msra.gmra.mxu3 %vm178_vm0, %v519_v38 }
 0x2e9   :  { %v1135_v39 = vpop.eup %1134  ;;  %v502_v29 = vsel %vm1656_vm13, %v1131_v13, %v498_v40  ;;  %v593_v13 = vmul.f32 %v1146_v12, %v1611_v34 }
 0x2ea   :  { %v893_v8 = vmul.f32 %v1135_v39, %v885_v27  ;;  %v487_v45 = vsel %vm486_vm15, %v1133_v3, %v483_v1  ;;  %v507_v50 = vsel %vm504_vm3, %v506_v2, %v502_v29  ;;  %vm898_vm5 = vweird.f32 %v1135_v39  ;;  %v1148_v3 = vld [vmem:[%s1788_s0 + $0x38] sm:$0xff] }
 0x2eb   :  { %v492_v41 = vsel %vm489_vm2, %v491_v43, %v487_v45  ;;  %v508_v44 = vmul.f32 %v1551_v33, %v507_v50  ;;  %vm899_vm7 = vmor %vm897_vm6, %vm898_vm5  ;;  %v606_v18 = vmul.f32 %v1148_v3, %v1636_v10  ;;  %v1150_v27 = vld [vmem:[%s1788_s0 + $0x18] sm:$0xff] }
 0x2ec   :  { %v894_v48 = vsub.f32 1.0, %v893_v8  ;;  %v493_v5 = vmul.f32 %v1553_v36, %v492_v41  ;;  %v1037_v36 = vld [vmem:[%s1789_s1 + $0x28] sm:$0x3]  ;;  %v597_v30 = vmul.f32 %v1150_v27, %v1619_v55 }
 0x2ed   :  { %v518_v63 = vmul.f32 5.0, %v508_v44  ;;  %vm515_vm9 = vcmp.ge.f32.partialorder %v1037_v36, 0.8 }
 0x2ee   :  { %v895_v51 = vmul.f32 %v1135_v39, %v894_v48  ;;  %v517_v54 = vmul.f32 5.0, %v493_v5  ;;  %v600_v6 = vadd.f32 %v597_v30, %v592_v26  ;;  %v1059_v5 = vld [vmem:[%s1789_s1 + $0x30] sm:$0xff] }
 0x2ef   :  { %v521_v0 = vsel %vm515_vm9, %v518_v63, 0.0 }
 0x2f0   :  { %v896_v52 = vadd.f32 %v1135_v39, %v895_v51  ;;  %v520_v56 = vsel %vm514_vm4, %v517_v54, 0.0  ;;  %v608_v28 = vadd.f32 %v605_v32, %v600_v6  ;;  %vm727_vm4 = vcmp.ge.f32.partialorder %v1059_v5, 0.8 }
 0x2f1   :  { %1040 = vmatmul.msk.f32.gmra.mxu3 %vm178_vm0, %v520_v56 }
 0x2f2   :  { %v900_v59 = vsel %vm899_vm7, %v1135_v39, %v896_v52  ;;  %v613_v34 = vadd.f32 %v1643_v24, %v608_v28 }
 0x2f3   :  { %v905_v62 = vsel %vm902_vm8, %v904_v58, %v900_v59  ;;  %v1060_v59 = vld [vmem:[%s1789_s1 + $0x38] sm:$0xff] }
 0x2f4   :  { %v906_v9 = vmul.f32 %v1559_v37, %v905_v62  ;;  %v598_v37 = vmul.f32 %v1147_v17, %v1619_v55 }
 0x2f6   :  { %v944_v33 = vmul.f32 5.0, %v906_v9  ;;  %v601_v19 = vadd.f32 %v598_v37, %v593_v13  ;;  %v1084_v9 = vld [vmem:[%s1789_s1 + $0x50] sm:$0xff] }
 0x2f8   :  { %v947_v11 = vsel %vm941_vm10, %v944_v33, 0.0  ;;  %v609_v14 = vadd.f32 %v606_v18, %v601_v19  ;;  %vm728_vm10 = vcmp.ge.f32.partialorder %v1060_v59, 0.8 }
 0x2f9   :  { %1041 = vmatmul.msk.f32.gmra.mxu3 %vm178_vm0, %v521_v0  ;;  %1087 = vmatmul.msk.f32.vlgmr.msrb.gmra.mxu2 %vm178_vm0, %v947_v11 }
 0x2fa   :  { %v614_v20 = vadd.f32 %v1643_v24, %v609_v14 }
 0x2fc   :  { %762 = vmatpush.msrb.mxu3 %v614_v20 }
 0x2fe   :  { %763 = vmatpush.msrb.mxu3 %v613_v34 }
 0x341   :  { %v671_v21 = vpop.xlane.xlu0 %670 }
 0x342   :  { %1136 = vrcp.f32 %v671_v21  ;;  %v689_v49 = vand.u32 2147483648, %v671_v21  ;;  %v687_v10 = vand.u32 2147483647, %v671_v21  ;;  %vm683_vm12 = vweird.f32 %v671_v21 }
 0x344   :  { %v690_v24 = vor.u32 1.1754944e-38, %v689_v49  ;;  %vm688_vm14 = vcmp.eq.f32.partialorder %v687_v10, 8.507059e+37 }
 0x348   :  { %v1137_v35 = vpop.eup %1136 }
 0x349   :  { %v679_v31 = vmul.f32 %v1137_v35, %v671_v21  ;;  %v888_v55 = vpop.xlane.xlu0 %887  ;;  %vm684_vm11 = vweird.f32 %v1137_v35 }
 0x34a   :  { %1138 = vrcp.f32 %v888_v55  ;;  %v674_v22 = vpop.xlane.xlu2 %673  ;;  %vm685_vm13 = vmor %vm683_vm12, %vm684_vm11  ;;  %v916_v41 = vand.u32 2147483647, %v888_v55  ;;  %v918_v50 = vand.u32 2147483648, %v888_v55  ;;  %vm912_vm3 = vweird.f32 %v888_v55 }
 0x34b   :  { %v680_v7 = vsub.f32 1.0, %v679_v31  ;;  %1140 = vrcp.f32 %v674_v22  ;;  %v704_v51 = vand.u32 2147483648, %v674_v22  ;;  %v702_v52 = vand.u32 2147483647, %v674_v22 }
 0x34c   :  { %vm698_vm6 = vweird.f32 %v674_v22  ;;  %vm917_vm7 = vcmp.eq.f32.partialorder %v916_v41, 8.507059e+37  ;;  %v919_v62 = vor.u32 1.1754944e-38, %v918_v50  ;;  %vm942_vm11 = vcmp.ge.f32.partialorder %v1084_v9, 0.8 }
 0x34d   :  { %v681_v40 = vmul.f32 %v1137_v35, %v680_v7  ;;  %vm703_vm9 = vcmp.eq.f32.partialorder %v702_v52, 8.507059e+37  ;;  %v1061_v7 = vld [vmem:[%s1789_s1 + $0x40] sm:$0x3] }
 0x34f   :  { %v682_v38 = vadd.f32 %v1137_v35, %v681_v40 }
 0x350   :  { %v1139_v1 = vpop.eup %1138 }
 0x351   :  { %v1141_v4 = vpop.eup %1140  ;;  %v908_v39 = vmul.f32 %v1139_v1, %v888_v55  ;;  %v686_v43 = vsel %vm685_vm13, %v1137_v35, %v682_v38  ;;  %vm913_vm15 = vweird.f32 %v1139_v1  ;;  %v1085_v55 = vld [vmem:[%s1789_s1 + $0x58] sm:$0x3] }
 0x352   :  { %v694_v8 = vmul.f32 %v1141_v4, %v674_v22  ;;  %v1706_v45 = vpop.xlane.xlu2 %890  ;;  %v1708_v47 = vpop.xlane.xlu1 %676  ;;  %v691_v2 = vsel %vm688_vm14, %v690_v24, %v686_v43  ;;  %vm699_vm2 = vweird.f32 %v1141_v4  ;;  %vm1716_vm5 = vmor %vm912_vm3, %vm913_vm15 }
 0x353   :  { %v909_v29 = vsub.f32 1.0, %v908_v39  ;;  %1142 = vrcp.f32 %v1706_v45  ;;  %v692_v54 = vmul.f32 %v1576_v15, %v691_v2  ;;  %vm700_vm8 = vmor %vm698_vm6, %vm699_vm2  ;;  %v705_v15 = vor.u32 1.1754944e-38, %v704_v51 }
 0x354   :  { %v695_v48 = vsub.f32 1.0, %v694_v8  ;;  %1144 = vrcp.f32 %v1708_v47  ;;  %v931_v23 = vand.u32 2147483647, %v1706_v45  ;;  %v933_v26 = vand.u32 2147483648, %v1706_v45 }
 0x355   :  { %v910_v16 = vmul.f32 %v1139_v1, %v909_v29  ;;  %v730_v58 = vmul.f32 5.0, %v692_v54  ;;  %v719_v30 = vand.u32 2147483648, %v1708_v47  ;;  %v717_v20 = vand.u32 2147483647, %v1708_v47 }
 0x356   :  { %v696_v53 = vmul.f32 %v1141_v4, %v695_v48  ;;  %vm927_vm14 = vweird.f32 %v1706_v45  ;;  %v934_v34 = vor.u32 1.1754944e-38, %v933_v26  ;;  %vm713_vm2 = vweird.f32 %v1708_v47 }
 0x357   :  { %v911_v56 = vadd.f32 %v1139_v1, %v910_v16  ;;  %v733_v11 = vsel %vm727_vm4, %v730_v58, 0.0  ;;  %vm932_vm3 = vcmp.eq.f32.partialorder %v931_v23, 8.507059e+37  ;;  %v720_v35 = vor.u32 1.1754944e-38, %v719_v30 }
 0x358   :  { %v697_v36 = vadd.f32 %v1141_v4, %v696_v53  ;;  %1063 = vmatmul.msk.f32.vlgmr.msrb.gmra.mxu3 %vm178_vm0, %v733_v11  ;;  %vm943_vm6 = vcmp.ge.f32.partialorder %v1085_v55, 0.8 }
 0x359   :  { %v1143_v61 = vpop.eup %1142  ;;  %v915_v63 = vsel %vm1716_vm5, %v1139_v1, %v911_v56  ;;  %vm718_vm5 = vcmp.eq.f32.partialorder %v717_v20, 8.507059e+37 }
 0x35a   :  { %v1145_v33 = vpop.eup %1144  ;;  %v923_v0 = vmul.f32 %v1143_v61, %v1706_v45  ;;  %v701_v12 = vsel %vm700_vm8, %v1141_v4, %v697_v36  ;;  %v920_v37 = vsel %vm917_vm7, %v919_v62, %v915_v63  ;;  %vm928_vm12 = vweird.f32 %v1143_v61 }
 0x35b   :  { %v709_v13 = vmul.f32 %v1145_v33, %v1708_v47  ;;  %v706_v17 = vsel %vm703_vm9, %v705_v15, %v701_v12  ;;  %v921_v19 = vmul.f32 %v1596_v42, %v920_v37  ;;  %vm714_vm13 = vweird.f32 %v1145_v33  ;;  %vm929_vm15 = vmor %vm927_vm14, %vm928_vm12 }
 0x35c   :  { %v924_v3 = vsub.f32 1.0, %v923_v0  ;;  %v707_v18 = vmul.f32 %v1600_v46, %v706_v17  ;;  %vm715_vm4 = vmor %vm713_vm2, %vm714_vm13  ;;  %vm729_vm7 = vcmp.ge.f32.partialorder %v1061_v7, 0.8 }
 0x35d   :  { %v710_v27 = vsub.f32 1.0, %v709_v13  ;;  %v945_v25 = vmul.f32 5.0, %v921_v19 }
 0x35e   :  { %v925_v14 = vmul.f32 %v1143_v61, %v924_v3  ;;  %v731_v6 = vmul.f32 5.0, %v707_v18 }
 0x35f   :  { %v711_v32 = vmul.f32 %v1145_v33, %v710_v27  ;;  %v948_v46 = vsel %vm942_vm11, %v945_v25, 0.0 }
 0x360   :  { %v926_v28 = vadd.f32 %v1143_v61, %v925_v14  ;;  %v734_v42 = vsel %vm728_vm10, %v731_v6, 0.0  ;;  %1088 = vmatmul.msk.f32.gmra.mxu2 %vm178_vm0, %v948_v46 }
 0x361   :  { %v712_v21 = vadd.f32 %v1145_v33, %v711_v32  ;;  %1064 = vmatmul.msk.f32.gmra.mxu3 %vm178_vm0, %v734_v42 }
 0x362   :  { %v930_v31 = vsel %vm929_vm15, %v1143_v61, %v926_v28 }
 0x363   :  { %v716_v22 = vsel %vm715_vm4, %v1145_v33, %v712_v21  ;;  %v935_v40 = vsel %vm932_vm3, %v934_v34, %v930_v31 }
 0x364   :  { %v721_v49 = vsel %vm718_vm5, %v720_v35, %v716_v22  ;;  %v936_v10 = vmul.f32 %v1622_v57, %v935_v40 }
 0x365   :  { %v722_v38 = vmul.f32 %v1628_v60, %v721_v49 }
 0x366   :  { %v946_v1 = vmul.f32 5.0, %v936_v10 }
 0x367   :  { %v732_v4 = vmul.f32 5.0, %v722_v38 }
 0x368   :  { %v949_v24 = vsel %vm943_vm6, %v946_v1, 0.0 }
 0x369   :  { %v735_v39 = vsel %vm729_vm7, %v732_v4, 0.0  ;;  %1089 = vmatmul.msk.f32.gmra.mxu2 %vm178_vm0, %v949_v24 }
 0x36a   :  { %1065 = vmatmul.msk.f32.gmra.mxu3 %vm178_vm0, %v735_v39 }
 0x36b   :  { %v551_v43 = vpop.f32.mrf.mxu3 }
 0x36c   :  { %1042 = vst.msk [vmem:[%s1796_s8 + $0x18] sm:$0xff] %vm178_vm0, %v551_v43 }
 0x374   :  { %v554_v8 = vpop.f32.mrf.mxu3 }
 0x375   :  { %1043 = vst.msk [vmem:[%s1796_s8 + $0x20] sm:$0xff] %vm178_vm0, %v554_v8 }
 0x37c   :  { %v557_v57 = vpop.f32.mrf.mxu3  ;;  %v979_v60 = vpop.f32.mrf.mxu2 }
 0x37d   :  { %1044 = vst.msk [vmem:[%s1796_s8 + $0x28] sm:$0x3] %vm229_vm1, %v557_v57 }
 0x37e   :  { %1090 = vst.msk [vmem:[%s1796_s8 + $0x48] sm:$0xff] %vm178_vm0, %v979_v60 }
 0x3db   :  { %v765_v45 = vpop.f32.mrf.mxu3 }
 0x3dc   :  { %1066 = vst.msk [vmem:[%s1796_s8 + $0x30] sm:$0xff] %vm178_vm0, %v765_v45 }
 0x3e3   :  { %v982_v47 = vpop.f32.mrf.mxu2 }
 0x3e4   :  { %1091 = vst.msk [vmem:[%s1796_s8 + $0x50] sm:$0xff] %vm178_vm0, %v982_v47  ;;  %v768_v29 = vpop.f32.mrf.mxu3 }
 0x3e5   :  { %1067 = vst.msk [vmem:[%s1796_s8 + $0x38] sm:$0xff] %vm178_vm0, %v768_v29 }
 0x3ec   :  { %v985_v2 = vpop.f32.mrf.mxu2 }
 0x3ed   :  { %1092 = vst.msk [vmem:[%s1796_s8 + $0x58] sm:$0x3] %vm229_vm1, %v985_v2  ;;  %v771_v41 = vpop.f32.mrf.mxu3 }
 0x3ee   :  { %1068 = vst.msk [vmem:[%s1796_s8 + $0x40] sm:$0x3] %vm229_vm1, %v771_v41 }
 0x3ef   :  { %996 = vsyncpa [#allocation4], 1 }
 0x3f0   :  { %997 = vsyncpa [#allocation6], 1 }
 0x3f1   :  { %998 = vsyncpa [#allocation9], 1 }

</bundles_post_ra>
